<compile_context>
chip_gen: v7x
topology: tpu7x:2x2x1
jax: 0.10.0
libtpu: 0.0.40
codegen_flags: <defaults>
</compile_context>

<pallas_src>
import math
import functools

import jax
import jax.numpy as jnp
from jax.experimental import pallas as pl
from jax.experimental.pallas import tpu as pltpu


def _choose_q_tile(n, max_tile=512):
    """Largest multiple-of-8 divisor of n that is <= max_tile (else n)."""
    if n <= max_tile:
        return n
    t = max_tile - (max_tile % 8)
    while t >= 8:
        if n % t == 0:
            return t
        t -= 8
    return n


def _vmem_bytes_estimate(N, TQ, C, G, itemsize):
    """Rough per-step VMEM footprint used to size vmem_limit_bytes."""
    weights = 4 * C * C * 4 + 8 * C * 4 + C * G * 4       # projections + GN params + gmat
    acts = 2 * 2 * N * C * itemsize                       # double-buffered xq, xkv blocks
    outs = 2 * TQ * C * itemsize                          # double-buffered output block
    scratch = 2 * N * C * 4 + 2 * C * 4                   # K/V cache + GN affine
    live = (2 * TQ * N + 4 * TQ * C + 2 * N * C) * 4      # scores/exp + q_all/acc + xkv temps
    return weights + acts + outs + scratch + live


def make_cross_attention_kernel(num_heads, head_dim, channels, q_tile,
                                elems_per_group):
    """Factory closing over the static configuration."""
    eps = 1e-5
    inv_elems = 1.0 / float(elems_per_group)

    def kernel(xq_ref, xkv_ref,
               gq_ref, bgq_ref, gkv_ref, bgkv_ref,
               wq_ref, bq_ref, wk_ref, bk_ref, wv_ref, bv_ref,
               wo_ref, bo_ref, gmat_ref,
               out_ref,
               k_sc, v_sc, qa_sc, qb_sc):
        qt = pl.program_id(1)
        gmat = gmat_ref[...]                              # (C, G) one-hot membership

        def gn_stats(x):
            # Per-group stats via matmul against the one-hot membership matrix
            # (avoids lane-splitting reshapes in-kernel).
            col_sum = jnp.sum(x, axis=0, keepdims=True)                       # (1, C)
            col_sq = jnp.sum(x * x, axis=0, keepdims=True)                    # (1, C)
            gsum = jnp.dot(col_sum, gmat, preferred_element_type=jnp.float32)  # (1, G)
            gsq = jnp.dot(col_sq, gmat, preferred_element_type=jnp.float32)    # (1, G)
            mean_g = gsum * inv_elems
            var_g = jnp.maximum(gsq * inv_elems - mean_g * mean_g, 0.0)
            # broadcast group stats back to per-channel (contract over G, no .T)
            mean_c = jax.lax.dot_general(mean_g, gmat, (((1,), (1,)), ((), ())),
                                         preferred_element_type=jnp.float32)   # (1, C)
            var_c = jax.lax.dot_general(var_g, gmat, (((1,), (1,)), ((), ())),
                                        preferred_element_type=jnp.float32)    # (1, C)
            return mean_c, jax.lax.rsqrt(var_c + eps)

        # --- once per batch (qt == 0): K/V projections + query GN affine ----
        @pl.when(qt == 0)
        def _():
            xkv = xkv_ref[0].astype(jnp.float32)                              # (N, C)
            m_c, inv_c = gn_stats(xkv)
            xkv_n = (xkv - m_c) * (inv_c * gkv_ref[...]) + bgkv_ref[...]
            k_sc[...] = (jnp.dot(xkv_n, wk_ref[...],
                                 preferred_element_type=jnp.float32) + bk_ref[...])
            v_sc[...] = (jnp.dot(xkv_n, wv_ref[...],
                                 preferred_element_type=jnp.float32) + bv_ref[...])

            xq_full = xq_ref[0].astype(jnp.float32)                           # (N, C)
            mq_c, invq_c = gn_stats(xq_full)
            a = invq_c * gq_ref[...]
            qa_sc[...] = a
            qb_sc[...] = bgq_ref[...] - mq_c * a

        # --- per query tile ---------------------------------------------------
        row0 = pl.multiple_of(qt * q_tile, q_tile)
        xq_t = xq_ref[0, pl.ds(row0, q_tile), :].astype(jnp.float32)          # (TQ, C)
        xq_n = xq_t * qa_sc[...] + qb_sc[...]                                 # GN(x_q)

        # Single full-width query projection (all heads at once); the
        # 1/sqrt(head_dim) scale is already folded into wq / bq.
        q_all = (jnp.dot(xq_n, wq_ref[...],
                         preferred_element_type=jnp.float32) + bq_ref[...])   # (TQ, C)

        o_acc = jnp.zeros((q_tile, channels), jnp.float32)
        for h in range(num_heads):
            lo = h * head_dim
            hi = lo + head_dim
            qh = q_all[:, lo:hi]                                              # (TQ, Dh)
            kh = k_sc[:, lo:hi]                                               # (N, Dh)
            vh = v_sc[:, lo:hi]                                               # (N, Dh)

            # q @ k^T without materializing a transpose
            s = jax.lax.dot_general(qh, kh, (((1,), (1,)), ((), ())),
                                    preferred_element_type=jnp.float32)       # (TQ, N)
            s = s - jnp.max(s, axis=-1, keepdims=True)
            p = jnp.exp(s)
            denom = jnp.sum(p, axis=-1, keepdims=True)                        # (TQ, 1)
            pv = jnp.dot(p, vh, preferred_element_type=jnp.float32)           # (TQ, Dh)
            pv = pv * pl.reciprocal(denom, approx=True)                       # deferred softmax norm
            # fuse the output projection per head -> full-lane accumulator
            o_acc = o_acc + jnp.dot(pv, wo_ref[lo:hi, :],
                                    preferred_element_type=jnp.float32)       # (TQ, C)

        out_ref[0] = (xq_t + o_acc + bo_ref[...]).astype(out_ref.dtype)

    return kernel


def cross_attention_2d(x_q, x_kv, params, num_heads=4, num_groups=8,
                       max_q_tile=512):
    """Pallas implementation of CrossAttention2d.forward. x_q, x_kv are NCHW."""
    B, C, H, W = x_q.shape
    N = H * W
    head_dim = C // num_heads
    cg = C // num_groups
    elems_per_group = N * cg
    TQ = _choose_q_tile(N, max_q_tile)
    n_q_tiles = N // TQ

    # NCHW -> (B, N, C)
    # TODO(synk): at model scale, consider allow_input_fusion so XLA fuses this
    # transpose into the pallas_call's input DMA instead of a full HBM round trip.
    xq = jnp.transpose(x_q.reshape(B, C, N), (0, 2, 1))
    xkv = jnp.transpose(x_kv.reshape(B, C, N), (0, 2, 1))

    # group membership one-hot matrix (C, G)
    gmat = (jnp.arange(C)[:, None] // cg ==
            jnp.arange(num_groups)[None, :]).astype(jnp.float32)

    scale = 1.0 / math.sqrt(head_dim)

    def row(v):  # (C,) -> (1, C) for lane-friendly broadcasting
        return v.reshape(1, C)

    kernel = make_cross_attention_kernel(num_heads, head_dim, C, TQ,
                                         float(elems_per_group))

    inputs = (
        xq, xkv,
        row(params["gn_q_gamma"]), row(params["gn_q_beta"]),
        row(params["gn_kv_gamma"]), row(params["gn_kv_beta"]),
        params["wq"].T * scale, row(params["bq"]) * scale,   # scale folded into q proj
        params["wk"].T, row(params["bk"]),
        params["wv"].T, row(params["bv"]),
        params["wo"].T, row(params["bo"]),
        gmat,
    )

    full2d = lambda shape: pl.BlockSpec(shape, lambda b, qt: (0, 0))
    per_batch = pl.BlockSpec((1, N, C), lambda b, qt: (b, 0, 0))
    out_spec = pl.BlockSpec((1, TQ, C), lambda b, qt: (b, qt, 0))

    in_specs = [
        per_batch, per_batch,
        full2d((1, C)), full2d((1, C)), full2d((1, C)), full2d((1, C)),
        full2d((C, C)), full2d((1, C)),
        full2d((C, C)), full2d((1, C)),
        full2d((C, C)), full2d((1, C)),
        full2d((C, C)), full2d((1, C)),
        full2d((C, num_groups)),
    ]

    scratch_shapes = [
        pltpu.VMEM((N, C), jnp.float32),   # K cache (per batch)
        pltpu.VMEM((N, C), jnp.float32),   # V cache (per batch)
        pltpu.VMEM((1, C), jnp.float32),   # query GroupNorm scale
        pltpu.VMEM((1, C), jnp.float32),   # query GroupNorm shift
    ]

    cp_kwargs = dict(dimension_semantics=("parallel", "arbitrary"))
    est = _vmem_bytes_estimate(N, TQ, C, num_groups, x_q.dtype.itemsize)
    if est > 16 * 1024 * 1024:   # only raise above the most conservative default
        cp_kwargs["vmem_limit_bytes"] = int(min(est * 5 // 4, 100 * 1024 * 1024))

    out = pl.pallas_call(
        kernel,
        out_shape=jax.ShapeDtypeStruct((B, N, C), x_q.dtype),
        grid_spec=pltpu.PrefetchScalarGridSpec(
            num_scalar_prefetch=0,
            grid=(B, n_q_tiles),
            in_specs=in_specs,
            out_specs=out_spec,
            scratch_shapes=scratch_shapes,
        ),
        compiler_params=pltpu.CompilerParams(**cp_kwargs),
    )(*inputs)

    # (B, N, C) -> NCHW
    return jnp.transpose(out, (0, 2, 1)).reshape(B, C, H, W)


def cross_attention_2d_reference(x_q, x_kv, params, num_heads=4, num_groups=8):
    """Pure-JAX reference reproducing the PyTorch forward exactly."""
    B, C, H, W = x_q.shape
    head_dim = C // num_heads

    def gn(x, gamma, beta):
        xg = x.reshape(B, num_groups, C // num_groups, H, W)
        mean = xg.mean(axis=(2, 3, 4), keepdims=True)
        var = xg.var(axis=(2, 3, 4), keepdims=True)
        xn = ((xg - mean) / jnp.sqrt(var + 1e-5)).reshape(B, C, H, W)
        return xn * gamma.reshape(1, C, 1, 1) + beta.reshape(1, C, 1, 1)

    def conv1x1(x, w, b):
        return jnp.einsum('oc,bchw->bohw', w, x) + b.reshape(1, C, 1, 1)

    q = conv1x1(gn(x_q, params["gn_q_gamma"], params["gn_q_beta"]),
                params["wq"], params["bq"]).reshape(B, num_heads, head_dim, H * W)
    kv_n = gn(x_kv, params["gn_kv_gamma"], params["gn_kv_beta"])
    k = conv1x1(kv_n, params["wk"], params["bk"]).reshape(B, num_heads, head_dim, H * W)
    v = conv1x1(kv_n, params["wv"], params["bv"]).reshape(B, num_heads, head_dim, H * W)

    attn = jnp.einsum('bhcn,bhcm->bhnm', q, k) / math.sqrt(head_dim)
    attn = jax.nn.softmax(attn, axis=-1)
    out = jnp.einsum('bhnm,bhcm->bhcn', attn, v).reshape(B, C, H, W)
    out = conv1x1(out, params["wo"], params["bo"])
    return x_q + out


def init_params(key, C):
    ks = jax.random.split(key, 12)
    return {
        "gn_q_gamma": 1.0 + 0.1 * jax.random.normal(ks[0], (C,), jnp.float32),
        "gn_q_beta": 0.1 * jax.random.normal(ks[1], (C,), jnp.float32),
        "gn_kv_gamma": 1.0 + 0.1 * jax.random.normal(ks[2], (C,), jnp.float32),
        "gn_kv_beta": 0.1 * jax.random.normal(ks[3], (C,), jnp.float32),
        "wq": 0.1 * jax.random.normal(ks[4], (C, C), jnp.float32),
        "bq": 0.1 * jax.random.normal(ks[5], (C,), jnp.float32),
        "wk": 0.1 * jax.random.normal(ks[6], (C, C), jnp.float32),
        "bk": 0.1 * jax.random.normal(ks[7], (C,), jnp.float32),
        "wv": 0.1 * jax.random.normal(ks[8], (C, C), jnp.float32),
        "bv": 0.1 * jax.random.normal(ks[9], (C,), jnp.float32),
        "wo": 0.1 * jax.random.normal(ks[10], (C, C), jnp.float32),
        "bo": 0.1 * jax.random.normal(ks[11], (C,), jnp.float32),
    }


if __name__ == "__main__":
    # Small shapes consistent with the module: GroupNorm(8, C) and num_heads=4
    # require C % 8 == 0 and C % 4 == 0.
    B, C, H, W = 2, 32, 8, 8
    num_heads, num_groups = 4, 8

    key = jax.random.PRNGKey(0)
    kx, kkv, kp = jax.random.split(key, 3)
    x_q = jax.random.normal(kx, (B, C, H, W), jnp.float32)
    x_kv = jax.random.normal(kkv, (B, C, H, W), jnp.float32)
    params = init_params(kp, C)

    run = jax.jit(functools.partial(cross_attention_2d,
                                    num_heads=num_heads, num_groups=num_groups))
    y = run(x_q, x_kv, params)
    jax.block_until_ready(y)

    y_ref = cross_attention_2d_reference(x_q, x_kv, params,
                                         num_heads=num_heads, num_groups=num_groups)
    assert y.shape == (B, C, H, W)
    # tolerance accounts for the approximate (EUP) reciprocal in the deferred
    # softmax normalisation; structural errors are far larger than this.
    assert jnp.allclose(y, y_ref, atol=5e-3, rtol=5e-3), (
        float(jnp.max(jnp.abs(y - y_ref))))
    print("KERNEL_OK")
</pallas_src>

<mosaic_0001>
module attributes {stable_mosaic.version = 11 : i64} {
  func.func @kernel(%arg0: i32, %arg1: i32, %arg2: memref<1x64x32xf32, #tpu.memory_space<vmem>>, %arg3: memref<1x64x32xf32, #tpu.memory_space<vmem>>, %arg4: memref<1x32xf32, #tpu.memory_space<vmem>>, %arg5: memref<1x32xf32, #tpu.memory_space<vmem>>, %arg6: memref<1x32xf32, #tpu.memory_space<vmem>>, %arg7: memref<1x32xf32, #tpu.memory_space<vmem>>, %arg8: memref<32x32xf32, #tpu.memory_space<vmem>>, %arg9: memref<1x32xf32, #tpu.memory_space<vmem>>, %arg10: memref<32x32xf32, #tpu.memory_space<vmem>>, %arg11: memref<1x32xf32, #tpu.memory_space<vmem>>, %arg12: memref<32x32xf32, #tpu.memory_space<vmem>>, %arg13: memref<1x32xf32, #tpu.memory_space<vmem>>, %arg14: memref<32x32xf32, #tpu.memory_space<vmem>>, %arg15: memref<1x32xf32, #tpu.memory_space<vmem>>, %arg16: memref<32x8xf32, #tpu.memory_space<vmem>>, %arg17: memref<1x64x32xf32, #tpu.memory_space<vmem>>, %arg18: memref<64x32xf32, #tpu.memory_space<vmem>>, %arg19: memref<64x32xf32, #tpu.memory_space<vmem>>, %arg20: memref<1x32xf32, #tpu.memory_space<vmem>>, %arg21: memref<1x32xf32, #tpu.memory_space<vmem>>) attributes {dimension_semantics = [#tpu.dimension_semantics<parallel>, #tpu.dimension_semantics<arbitrary>], iteration_bounds = array<i64: 2, 1>, scalar_prefetch = 0 : i64, scratch_operands = 4 : i64, tpu.core_type = #tpu.core_type<tc>, window_params = [{transform_indices = @transform_0, window_bounds = array<i64: 1, 64, 32>}, {transform_indices = @transform_1, window_bounds = array<i64: 1, 64, 32>}, {pipeline_mode = #tpu.pipeline_mode<synchronous>, transform_indices = @transform_2, window_bounds = array<i64: 1, 32>}, {pipeline_mode = #tpu.pipeline_mode<synchronous>, transform_indices = @transform_3, window_bounds = array<i64: 1, 32>}, {pipeline_mode = #tpu.pipeline_mode<synchronous>, transform_indices = @transform_4, window_bounds = array<i64: 1, 32>}, {pipeline_mode = #tpu.pipeline_mode<synchronous>, transform_indices = @transform_5, window_bounds = array<i64: 1, 32>}, {pipeline_mode = #tpu.pipeline_mode<synchronous>, transform_indices = @transform_6, window_bounds = array<i64: 32, 32>}, {pipeline_mode = #tpu.pipeline_mode<synchronous>, transform_indices = @transform_7, window_bounds = array<i64: 1, 32>}, {pipeline_mode = #tpu.pipeline_mode<synchronous>, transform_indices = @transform_8, window_bounds = array<i64: 32, 32>}, {pipeline_mode = #tpu.pipeline_mode<synchronous>, transform_indices = @transform_9, window_bounds = array<i64: 1, 32>}, {pipeline_mode = #tpu.pipeline_mode<synchronous>, transform_indices = @transform_10, window_bounds = array<i64: 32, 32>}, {pipeline_mode = #tpu.pipeline_mode<synchronous>, transform_indices = @transform_11, window_bounds = array<i64: 1, 32>}, {pipeline_mode = #tpu.pipeline_mode<synchronous>, transform_indices = @transform_12, window_bounds = array<i64: 32, 32>}, {pipeline_mode = #tpu.pipeline_mode<synchronous>, transform_indices = @transform_13, window_bounds = array<i64: 1, 32>}, {pipeline_mode = #tpu.pipeline_mode<synchronous>, transform_indices = @transform_14, window_bounds = array<i64: 32, 8>}, {transform_indices = @transform_15, window_bounds = array<i64: 1, 64, 32>}]} {
    %c0 = arith.constant 0 : index
    %c0_0 = arith.constant 0 : index
    %0 = vector.load %arg16[%c0, %c0_0] : memref<32x8xf32, #tpu.memory_space<vmem>>, vector<32x8xf32>
    %c0_i32 = arith.constant 0 : i32
    %1 = arith.cmpi eq, %arg1, %c0_i32 : i32
    %2 = arith.extui %1 : i1 to i32
    %c0_i32_1 = arith.constant 0 : i32
    %3 = arith.cmpi ne, %2, %c0_i32_1 : i32
    scf.if %3 {
      %c0_59 = arith.constant 0 : index
      %c0_60 = arith.constant 0 : index
      %c0_61 = arith.constant 0 : index
      %100 = vector.load %arg3[%c0_59, %c0_60, %c0_61] : memref<1x64x32xf32, #tpu.memory_space<vmem>>, vector<1x64x32xf32>
      %101 = vector.shape_cast %100 : vector<1x64x32xf32> to vector<64x32xf32>
      %cst_62 = arith.constant dense<0.000000e+00> : vector<32xf32>
      %102 = vector.multi_reduction <add>, %101, %cst_62 [0] : vector<64x32xf32> to vector<32xf32>
      %103 = vector.shape_cast %102 : vector<32xf32> to vector<1x32xf32>
      %104 = arith.mulf %101, %101 : vector<64x32xf32>
      %cst_63 = arith.constant dense<0.000000e+00> : vector<32xf32>
      %105 = vector.multi_reduction <add>, %104, %cst_63 [0] : vector<64x32xf32> to vector<32xf32>
      %106 = vector.shape_cast %105 : vector<32xf32> to vector<1x32xf32>
      %cst_64 = arith.constant dense<0.000000e+00> : vector<1x8xf32>
      %107 = tpu.matmul %103, %0, %cst_64 {dimension_numbers = #tpu.dot_dimension_numbers<[1], [0], [0], [1], [0, 0, 1, 1], [], []>} : vector<1x32xf32>, vector<32x8xf32>, vector<1x8xf32> -> vector<1x8xf32>
      %cst_65 = arith.constant dense<0.000000e+00> : vector<1x8xf32>
      %108 = tpu.matmul %106, %0, %cst_65 {dimension_numbers = #tpu.dot_dimension_numbers<[1], [0], [0], [1], [0, 0, 1, 1], [], []>} : vector<1x32xf32>, vector<32x8xf32>, vector<1x8xf32> -> vector<1x8xf32>
      %cst_66 = arith.constant 3.906250e-03 : f32
      %109 = vector.broadcast %cst_66 : f32 to vector<1x8xf32>
      %110 = arith.mulf %107, %109 : vector<1x8xf32>
      %cst_67 = arith.constant 3.906250e-03 : f32
      %111 = vector.broadcast %cst_67 : f32 to vector<1x8xf32>
      %112 = arith.mulf %108, %111 : vector<1x8xf32>
      %113 = arith.mulf %110, %110 : vector<1x8xf32>
      %114 = arith.subf %112, %113 : vector<1x8xf32>
      %cst_68 = arith.constant 0.000000e+00 : f32
      %115 = vector.broadcast %cst_68 : f32 to vector<1x8xf32>
      %116 = arith.maximumf %114, %115 : vector<1x8xf32>
      %cst_69 = arith.constant dense<0.000000e+00> : vector<1x32xf32>
      %117 = tpu.matmul %110, %0, %cst_69 {dimension_numbers = #tpu.dot_dimension_numbers<[1], [1], [0], [0], [0, 0, 1, 0], [], []>} : vector<1x8xf32>, vector<32x8xf32>, vector<1x32xf32> -> vector<1x32xf32>
      %cst_70 = arith.constant dense<0.000000e+00> : vector<1x32xf32>
      %118 = tpu.matmul %116, %0, %cst_70 {dimension_numbers = #tpu.dot_dimension_numbers<[1], [1], [0], [0], [0, 0, 1, 0], [], []>} : vector<1x8xf32>, vector<32x8xf32>, vector<1x32xf32> -> vector<1x32xf32>
      %cst_71 = arith.constant 9.99999974E-6 : f32
      %119 = vector.broadcast %cst_71 : f32 to vector<1x32xf32>
      %120 = arith.addf %118, %119 : vector<1x32xf32>
      %121 = math.rsqrt %120 : vector<1x32xf32>
      %122 = vector.broadcast %117 : vector<1x32xf32> to vector<64x32xf32>
      %123 = arith.subf %101, %122 : vector<64x32xf32>
      %c0_72 = arith.constant 0 : index
      %c0_73 = arith.constant 0 : index
      %124 = vector.load %arg6[%c0_72, %c0_73] : memref<1x32xf32, #tpu.memory_space<vmem>>, vector<1x32xf32>
      %125 = arith.mulf %121, %124 : vector<1x32xf32>
      %126 = vector.broadcast %125 : vector<1x32xf32> to vector<64x32xf32>
      %127 = arith.mulf %123, %126 : vector<64x32xf32>
      %c0_74 = arith.constant 0 : index
      %c0_75 = arith.constant 0 : index
      %128 = vector.load %arg7[%c0_74, %c0_75] : memref<1x32xf32, #tpu.memory_space<vmem>>, vector<1x32xf32>
      %129 = vector.broadcast %128 : vector<1x32xf32> to vector<64x32xf32>
      %130 = arith.addf %127, %129 : vector<64x32xf32>
      %c0_76 = arith.constant 0 : index
      %c0_77 = arith.constant 0 : index
      %131 = vector.load %arg10[%c0_76, %c0_77] : memref<32x32xf32, #tpu.memory_space<vmem>>, vector<32x32xf32>
      %cst_78 = arith.constant dense<0.000000e+00> : vector<64x32xf32>
      %132 = tpu.matmul %130, %131, %cst_78 {dimension_numbers = #tpu.dot_dimension_numbers<[1], [0], [0], [1], [0, 0, 1, 1], [], []>} : vector<64x32xf32>, vector<32x32xf32>, vector<64x32xf32> -> vector<64x32xf32>
      %c0_79 = arith.constant 0 : index
      %c0_80 = arith.constant 0 : index
      %133 = vector.load %arg11[%c0_79, %c0_80] : memref<1x32xf32, #tpu.memory_space<vmem>>, vector<1x32xf32>
      %134 = vector.broadcast %133 : vector<1x32xf32> to vector<64x32xf32>
      %135 = arith.addf %132, %134 : vector<64x32xf32>
      %c0_81 = arith.constant 0 : index
      %c0_82 = arith.constant 0 : index
      %136 = vector.load %arg18[%c0_81, %c0_82] : memref<64x32xf32, #tpu.memory_space<vmem>>, vector<64x32xf32>
      tpu.vector_store %arg18[%c0_81, %c0_82], %135 {strides = array<i32>} : memref<64x32xf32, #tpu.memory_space<vmem>>, vector<64x32xf32>,
      %c0_83 = arith.constant 0 : index
      %c0_84 = arith.constant 0 : index
      %137 = vector.load %arg12[%c0_83, %c0_84] : memref<32x32xf32, #tpu.memory_space<vmem>>, vector<32x32xf32>
      %cst_85 = arith.constant dense<0.000000e+00> : vector<64x32xf32>
      %138 = tpu.matmul %130, %137, %cst_85 {dimension_numbers = #tpu.dot_dimension_numbers<[1], [0], [0], [1], [0, 0, 1, 1], [], []>} : vector<64x32xf32>, vector<32x32xf32>, vector<64x32xf32> -> vector<64x32xf32>
      %c0_86 = arith.constant 0 : index
      %c0_87 = arith.constant 0 : index
      %139 = vector.load %arg13[%c0_86, %c0_87] : memref<1x32xf32, #tpu.memory_space<vmem>>, vector<1x32xf32>
      %140 = vector.broadcast %139 : vector<1x32xf32> to vector<64x32xf32>
      %141 = arith.addf %138, %140 : vector<64x32xf32>
      %c0_88 = arith.constant 0 : index
      %c0_89 = arith.constant 0 : index
      %142 = vector.load %arg19[%c0_88, %c0_89] : memref<64x32xf32, #tpu.memory_space<vmem>>, vector<64x32xf32>
      tpu.vector_store %arg19[%c0_88, %c0_89], %141 {strides = array<i32>} : memref<64x32xf32, #tpu.memory_space<vmem>>, vector<64x32xf32>,
      %c0_90 = arith.constant 0 : index
      %c0_91 = arith.constant 0 : index
      %c0_92 = arith.constant 0 : index
      %143 = vector.load %arg2[%c0_90, %c0_91, %c0_92] : memref<1x64x32xf32, #tpu.memory_space<vmem>>, vector<1x64x32xf32>
      %144 = vector.shape_cast %143 : vector<1x64x32xf32> to vector<64x32xf32>
      %cst_93 = arith.constant dense<0.000000e+00> : vector<32xf32>
      %145 = vector.multi_reduction <add>, %144, %cst_93 [0] : vector<64x32xf32> to vector<32xf32>
      %146 = vector.shape_cast %145 : vector<32xf32> to vector<1x32xf32>
      %147 = arith.mulf %144, %144 : vector<64x32xf32>
      %cst_94 = arith.constant dense<0.000000e+00> : vector<32xf32>
      %148 = vector.multi_reduction <add>, %147, %cst_94 [0] : vector<64x32xf32> to vector<32xf32>
      %149 = vector.shape_cast %148 : vector<32xf32> to vector<1x32xf32>
      %cst_95 = arith.constant dense<0.000000e+00> : vector<1x8xf32>
      %150 = tpu.matmul %146, %0, %cst_95 {dimension_numbers = #tpu.dot_dimension_numbers<[1], [0], [0], [1], [0, 0, 1, 1], [], []>} : vector<1x32xf32>, vector<32x8xf32>, vector<1x8xf32> -> vector<1x8xf32>
      %cst_96 = arith.constant dense<0.000000e+00> : vector<1x8xf32>
      %151 = tpu.matmul %149, %0, %cst_96 {dimension_numbers = #tpu.dot_dimension_numbers<[1], [0], [0], [1], [0, 0, 1, 1], [], []>} : vector<1x32xf32>, vector<32x8xf32>, vector<1x8xf32> -> vector<1x8xf32>
      %cst_97 = arith.constant 3.906250e-03 : f32
      %152 = vector.broadcast %cst_97 : f32 to vector<1x8xf32>
      %153 = arith.mulf %150, %152 : vector<1x8xf32>
      %cst_98 = arith.constant 3.906250e-03 : f32
      %154 = vector.broadcast %cst_98 : f32 to vector<1x8xf32>
      %155 = arith.mulf %151, %154 : vector<1x8xf32>
      %156 = arith.mulf %153, %153 : vector<1x8xf32>
      %157 = arith.subf %155, %156 : vector<1x8xf32>
      %cst_99 = arith.constant 0.000000e+00 : f32
      %158 = vector.broadcast %cst_99 : f32 to vector<1x8xf32>
      %159 = arith.maximumf %157, %158 : vector<1x8xf32>
      %cst_100 = arith.constant dense<0.000000e+00> : vector<1x32xf32>
      %160 = tpu.matmul %153, %0, %cst_100 {dimension_numbers = #tpu.dot_dimension_numbers<[1], [1], [0], [0], [0, 0, 1, 0], [], []>} : vector<1x8xf32>, vector<32x8xf32>, vector<1x32xf32> -> vector<1x32xf32>
      %cst_101 = arith.constant dense<0.000000e+00> : vector<1x32xf32>
      %161 = tpu.matmul %159, %0, %cst_101 {dimension_numbers = #tpu.dot_dimension_numbers<[1], [1], [0], [0], [0, 0, 1, 0], [], []>} : vector<1x8xf32>, vector<32x8xf32>, vector<1x32xf32> -> vector<1x32xf32>
      %cst_102 = arith.constant 9.99999974E-6 : f32
      %162 = vector.broadcast %cst_102 : f32 to vector<1x32xf32>
      %163 = arith.addf %161, %162 : vector<1x32xf32>
      %164 = math.rsqrt %163 : vector<1x32xf32>
      %c0_103 = arith.constant 0 : index
      %c0_104 = arith.constant 0 : index
      %165 = vector.load %arg4[%c0_103, %c0_104] : memref<1x32xf32, #tpu.memory_space<vmem>>, vector<1x32xf32>
      %166 = arith.mulf %164, %165 : vector<1x32xf32>
      %c0_105 = arith.constant 0 : index
      %c0_106 = arith.constant 0 : index
      %167 = vector.load %arg20[%c0_105, %c0_106] : memref<1x32xf32, #tpu.memory_space<vmem>>, vector<1x32xf32>
      tpu.vector_store %arg20[%c0_105, %c0_106], %166 {strides = array<i32>} : memref<1x32xf32, #tpu.memory_space<vmem>>, vector<1x32xf32>,
      %c0_107 = arith.constant 0 : index
      %c0_108 = arith.constant 0 : index
      %168 = vector.load %arg5[%c0_107, %c0_108] : memref<1x32xf32, #tpu.memory_space<vmem>>, vector<1x32xf32>
      %169 = arith.mulf %160, %166 : vector<1x32xf32>
      %170 = arith.subf %168, %169 : vector<1x32xf32>
      %c0_109 = arith.constant 0 : index
      %c0_110 = arith.constant 0 : index
      %171 = vector.load %arg21[%c0_109, %c0_110] : memref<1x32xf32, #tpu.memory_space<vmem>>, vector<1x32xf32>
      tpu.vector_store %arg21[%c0_109, %c0_110], %170 {strides = array<i32>} : memref<1x32xf32, #tpu.memory_space<vmem>>, vector<1x32xf32>,
    } else {
    }
    %c64_i32 = arith.constant 64 : i32
    %4 = arith.muli %arg1, %c64_i32 : i32
    %5 = tpu.assume_multiple %4, 64 : i32
    %c0_2 = arith.constant 0 : index
    %6 = arith.index_cast %5 : i32 to index
    %c0_3 = arith.constant 0 : index
    %7 = vector.load %arg2[%c0_2, %6, %c0_3] : memref<1x64x32xf32, #tpu.memory_space<vmem>>, vector<1x64x32xf32>
    %8 = vector.shape_cast %7 : vector<1x64x32xf32> to vector<64x32xf32>
    %c0_4 = arith.constant 0 : index
    %c0_5 = arith.constant 0 : index
    %9 = vector.load %arg20[%c0_4, %c0_5] : memref<1x32xf32, #tpu.memory_space<vmem>>, vector<1x32xf32>
    %10 = vector.broadcast %9 : vector<1x32xf32> to vector<64x32xf32>
    %11 = arith.mulf %8, %10 : vector<64x32xf32>
    %c0_6 = arith.constant 0 : index
    %c0_7 = arith.constant 0 : index
    %12 = vector.load %arg21[%c0_6, %c0_7] : memref<1x32xf32, #tpu.memory_space<vmem>>, vector<1x32xf32>
    %13 = vector.broadcast %12 : vector<1x32xf32> to vector<64x32xf32>
    %14 = arith.addf %11, %13 : vector<64x32xf32>
    %c0_8 = arith.constant 0 : index
    %c0_9 = arith.constant 0 : index
    %15 = vector.load %arg8[%c0_8, %c0_9] : memref<32x32xf32, #tpu.memory_space<vmem>>, vector<32x32xf32>
    %cst = arith.constant dense<0.000000e+00> : vector<64x32xf32>
    %16 = tpu.matmul %14, %15, %cst {dimension_numbers = #tpu.dot_dimension_numbers<[1], [0], [0], [1], [0, 0, 1, 1], [], []>} : vector<64x32xf32>, vector<32x32xf32>, vector<64x32xf32> -> vector<64x32xf32>
    %c0_10 = arith.constant 0 : index
    %c0_11 = arith.constant 0 : index
    %17 = vector.load %arg9[%c0_10, %c0_11] : memref<1x32xf32, #tpu.memory_space<vmem>>, vector<1x32xf32>
    %18 = vector.broadcast %17 : vector<1x32xf32> to vector<64x32xf32>
    %19 = arith.addf %16, %18 : vector<64x32xf32>
    %cst_12 = arith.constant 0.000000e+00 : f32
    %20 = vector.broadcast %cst_12 : f32 to vector<64x32xf32>
    %21 = vector.extract_strided_slice %19 {offsets = [0, 0], sizes = [64, 8], strides = [1, 1]} : vector<64x32xf32> to vector<64x8xf32>
    %c0_13 = arith.constant 0 : index
    %c0_14 = arith.constant 0 : index
    %22 = vector.load %arg18[%c0_13, %c0_14] : memref<64x32xf32, #tpu.memory_space<vmem>>, vector<64x8xf32>
    %c0_15 = arith.constant 0 : index
    %c0_16 = arith.constant 0 : index
    %23 = vector.load %arg19[%c0_15, %c0_16] : memref<64x32xf32, #tpu.memory_space<vmem>>, vector<64x8xf32>
    %cst_17 = arith.constant dense<0.000000e+00> : vector<64x64xf32>
    %24 = tpu.matmul %21, %22, %cst_17 {dimension_numbers = #tpu.dot_dimension_numbers<[1], [1], [0], [0], [0, 0, 1, 0], [], []>} : vector<64x8xf32>, vector<64x8xf32>, vector<64x64xf32> -> vector<64x64xf32>
    %cst_18 = arith.constant dense<0xFF800000> : vector<64xf32>
    %25 = vector.multi_reduction <maximumf>, %24, %cst_18 [1] : vector<64x64xf32> to vector<64xf32>
    %26 = vector.shape_cast %25 : vector<64xf32> to vector<64x1xf32>
    %27 = vector.broadcast %26 : vector<64x1xf32> to vector<64x64xf32>
    %28 = arith.subf %24, %27 : vector<64x64xf32>
    %29 = math.exp %28 : vector<64x64xf32>
    %cst_19 = arith.constant dense<0.000000e+00> : vector<64xf32>
    %30 = vector.multi_reduction <add>, %29, %cst_19 [1] : vector<64x64xf32> to vector<64xf32>
    %31 = vector.shape_cast %30 : vector<64xf32> to vector<64x1xf32>
    %cst_20 = arith.constant dense<0.000000e+00> : vector<64x8xf32>
    %32 = tpu.matmul %29, %23, %cst_20 {dimension_numbers = #tpu.dot_dimension_numbers<[1], [0], [0], [1], [0, 0, 1, 1], [], []>} : vector<64x64xf32>, vector<64x8xf32>, vector<64x8xf32> -> vector<64x8xf32>
    %33 = tpu.reciprocal %31 {approx = true} : vector<64x1xf32> -> vector<64x1xf32>
    %34 = vector.broadcast %33 : vector<64x1xf32> to vector<64x8xf32>
    %35 = arith.mulf %32, %34 : vector<64x8xf32>
    %c0_21 = arith.constant 0 : index
    %c0_22 = arith.constant 0 : index
    %36 = vector.load %arg14[%c0_21, %c0_22] : memref<32x32xf32, #tpu.memory_space<vmem>>, vector<8x32xf32>
    %cst_23 = arith.constant dense<0.000000e+00> : vector<64x32xf32>
    %37 = tpu.matmul %35, %36, %cst_23 {dimension_numbers = #tpu.dot_dimension_numbers<[1], [0], [0], [1], [0, 0, 1, 1], [], []>} : vector<64x8xf32>, vector<8x32xf32>, vector<64x32xf32> -> vector<64x32xf32>
    %38 = arith.addf %20, %37 : vector<64x32xf32>
    %39 = vector.extract_strided_slice %19 {offsets = [0, 8], sizes = [64, 8], strides = [1, 1]} : vector<64x32xf32> to vector<64x8xf32>
    %c0_24 = arith.constant 0 : index
    %c8 = arith.constant 8 : index
    %40 = vector.load %arg18[%c0_24, %c8] : memref<64x32xf32, #tpu.memory_space<vmem>>, vector<64x8xf32>
    %c0_25 = arith.constant 0 : index
    %c8_26 = arith.constant 8 : index
    %41 = vector.load %arg19[%c0_25, %c8_26] : memref<64x32xf32, #tpu.memory_space<vmem>>, vector<64x8xf32>
    %cst_27 = arith.constant dense<0.000000e+00> : vector<64x64xf32>
    %42 = tpu.matmul %39, %40, %cst_27 {dimension_numbers = #tpu.dot_dimension_numbers<[1], [1], [0], [0], [0, 0, 1, 0], [], []>} : vector<64x8xf32>, vector<64x8xf32>, vector<64x64xf32> -> vector<64x64xf32>
    %cst_28 = arith.constant dense<0xFF800000> : vector<64xf32>
    %43 = vector.multi_reduction <maximumf>, %42, %cst_28 [1] : vector<64x64xf32> to vector<64xf32>
    %44 = vector.shape_cast %43 : vector<64xf32> to vector<64x1xf32>
    %45 = vector.broadcast %44 : vector<64x1xf32> to vector<64x64xf32>
    %46 = arith.subf %42, %45 : vector<64x64xf32>
    %47 = math.exp %46 : vector<64x64xf32>
    %cst_29 = arith.constant dense<0.000000e+00> : vector<64xf32>
    %48 = vector.multi_reduction <add>, %47, %cst_29 [1] : vector<64x64xf32> to vector<64xf32>
    %49 = vector.shape_cast %48 : vector<64xf32> to vector<64x1xf32>
    %cst_30 = arith.constant dense<0.000000e+00> : vector<64x8xf32>
    %50 = tpu.matmul %47, %41, %cst_30 {dimension_numbers = #tpu.dot_dimension_numbers<[1], [0], [0], [1], [0, 0, 1, 1], [], []>} : vector<64x64xf32>, vector<64x8xf32>, vector<64x8xf32> -> vector<64x8xf32>
    %51 = tpu.reciprocal %49 {approx = true} : vector<64x1xf32> -> vector<64x1xf32>
    %52 = vector.broadcast %51 : vector<64x1xf32> to vector<64x8xf32>
    %53 = arith.mulf %50, %52 : vector<64x8xf32>
    %c8_31 = arith.constant 8 : index
    %c0_32 = arith.constant 0 : index
    %54 = vector.load %arg14[%c8_31, %c0_32] : memref<32x32xf32, #tpu.memory_space<vmem>>, vector<8x32xf32>
    %cst_33 = arith.constant dense<0.000000e+00> : vector<64x32xf32>
    %55 = tpu.matmul %53, %54, %cst_33 {dimension_numbers = #tpu.dot_dimension_numbers<[1], [0], [0], [1], [0, 0, 1, 1], [], []>} : vector<64x8xf32>, vector<8x32xf32>, vector<64x32xf32> -> vector<64x32xf32>
    %56 = arith.addf %38, %55 : vector<64x32xf32>
    %57 = vector.extract_strided_slice %19 {offsets = [0, 16], sizes = [64, 8], strides = [1, 1]} : vector<64x32xf32> to vector<64x8xf32>
    %c0_34 = arith.constant 0 : index
    %c16 = arith.constant 16 : index
    %58 = vector.load %arg18[%c0_34, %c16] : memref<64x32xf32, #tpu.memory_space<vmem>>, vector<64x8xf32>
    %c0_35 = arith.constant 0 : index
    %c16_36 = arith.constant 16 : index
    %59 = vector.load %arg19[%c0_35, %c16_36] : memref<64x32xf32, #tpu.memory_space<vmem>>, vector<64x8xf32>
    %cst_37 = arith.constant dense<0.000000e+00> : vector<64x64xf32>
    %60 = tpu.matmul %57, %58, %cst_37 {dimension_numbers = #tpu.dot_dimension_numbers<[1], [1], [0], [0], [0, 0, 1, 0], [], []>} : vector<64x8xf32>, vector<64x8xf32>, vector<64x64xf32> -> vector<64x64xf32>
    %cst_38 = arith.constant dense<0xFF800000> : vector<64xf32>
    %61 = vector.multi_reduction <maximumf>, %60, %cst_38 [1] : vector<64x64xf32> to vector<64xf32>
    %62 = vector.shape_cast %61 : vector<64xf32> to vector<64x1xf32>
    %63 = vector.broadcast %62 : vector<64x1xf32> to vector<64x64xf32>
    %64 = arith.subf %60, %63 : vector<64x64xf32>
    %65 = math.exp %64 : vector<64x64xf32>
    %cst_39 = arith.constant dense<0.000000e+00> : vector<64xf32>
    %66 = vector.multi_reduction <add>, %65, %cst_39 [1] : vector<64x64xf32> to vector<64xf32>
    %67 = vector.shape_cast %66 : vector<64xf32> to vector<64x1xf32>
    %cst_40 = arith.constant dense<0.000000e+00> : vector<64x8xf32>
    %68 = tpu.matmul %65, %59, %cst_40 {dimension_numbers = #tpu.dot_dimension_numbers<[1], [0], [0], [1], [0, 0, 1, 1], [], []>} : vector<64x64xf32>, vector<64x8xf32>, vector<64x8xf32> -> vector<64x8xf32>
    %69 = tpu.reciprocal %67 {approx = true} : vector<64x1xf32> -> vector<64x1xf32>
    %70 = vector.broadcast %69 : vector<64x1xf32> to vector<64x8xf32>
    %71 = arith.mulf %68, %70 : vector<64x8xf32>
    %c16_41 = arith.constant 16 : index
    %c0_42 = arith.constant 0 : index
    %72 = vector.load %arg14[%c16_41, %c0_42] : memref<32x32xf32, #tpu.memory_space<vmem>>, vector<8x32xf32>
    %cst_43 = arith.constant dense<0.000000e+00> : vector<64x32xf32>
    %73 = tpu.matmul %71, %72, %cst_43 {dimension_numbers = #tpu.dot_dimension_numbers<[1], [0], [0], [1], [0, 0, 1, 1], [], []>} : vector<64x8xf32>, vector<8x32xf32>, vector<64x32xf32> -> vector<64x32xf32>
    %74 = arith.addf %56, %73 : vector<64x32xf32>
    %75 = vector.extract_strided_slice %19 {offsets = [0, 24], sizes = [64, 8], strides = [1, 1]} : vector<64x32xf32> to vector<64x8xf32>
    %c0_44 = arith.constant 0 : index
    %c24 = arith.constant 24 : index
    %76 = vector.load %arg18[%c0_44, %c24] : memref<64x32xf32, #tpu.memory_space<vmem>>, vector<64x8xf32>
    %c0_45 = arith.constant 0 : index
    %c24_46 = arith.constant 24 : index
    %77 = vector.load %arg19[%c0_45, %c24_46] : memref<64x32xf32, #tpu.memory_space<vmem>>, vector<64x8xf32>
    %cst_47 = arith.constant dense<0.000000e+00> : vector<64x64xf32>
    %78 = tpu.matmul %75, %76, %cst_47 {dimension_numbers = #tpu.dot_dimension_numbers<[1], [1], [0], [0], [0, 0, 1, 0], [], []>} : vector<64x8xf32>, vector<64x8xf32>, vector<64x64xf32> -> vector<64x64xf32>
    %cst_48 = arith.constant dense<0xFF800000> : vector<64xf32>
    %79 = vector.multi_reduction <maximumf>, %78, %cst_48 [1] : vector<64x64xf32> to vector<64xf32>
    %80 = vector.shape_cast %79 : vector<64xf32> to vector<64x1xf32>
    %81 = vector.broadcast %80 : vector<64x1xf32> to vector<64x64xf32>
    %82 = arith.subf %78, %81 : vector<64x64xf32>
    %83 = math.exp %82 : vector<64x64xf32>
    %cst_49 = arith.constant dense<0.000000e+00> : vector<64xf32>
    %84 = vector.multi_reduction <add>, %83, %cst_49 [1] : vector<64x64xf32> to vector<64xf32>
    %85 = vector.shape_cast %84 : vector<64xf32> to vector<64x1xf32>
    %cst_50 = arith.constant dense<0.000000e+00> : vector<64x8xf32>
    %86 = tpu.matmul %83, %77, %cst_50 {dimension_numbers = #tpu.dot_dimension_numbers<[1], [0], [0], [1], [0, 0, 1, 1], [], []>} : vector<64x64xf32>, vector<64x8xf32>, vector<64x8xf32> -> vector<64x8xf32>
    %87 = tpu.reciprocal %85 {approx = true} : vector<64x1xf32> -> vector<64x1xf32>
    %88 = vector.broadcast %87 : vector<64x1xf32> to vector<64x8xf32>
    %89 = arith.mulf %86, %88 : vector<64x8xf32>
    %c24_51 = arith.constant 24 : index
    %c0_52 = arith.constant 0 : index
    %90 = vector.load %arg14[%c24_51, %c0_52] : memref<32x32xf32, #tpu.memory_space<vmem>>, vector<8x32xf32>
    %cst_53 = arith.constant dense<0.000000e+00> : vector<64x32xf32>
    %91 = tpu.matmul %89, %90, %cst_53 {dimension_numbers = #tpu.dot_dimension_numbers<[1], [0], [0], [1], [0, 0, 1, 1], [], []>} : vector<64x8xf32>, vector<8x32xf32>, vector<64x32xf32> -> vector<64x32xf32>
    %92 = arith.addf %74, %91 : vector<64x32xf32>
    %93 = arith.addf %8, %92 : vector<64x32xf32>
    %c0_54 = arith.constant 0 : index
    %c0_55 = arith.constant 0 : index
    %94 = vector.load %arg15[%c0_54, %c0_55] : memref<1x32xf32, #tpu.memory_space<vmem>>, vector<1x32xf32>
    %95 = vector.broadcast %94 : vector<1x32xf32> to vector<64x32xf32>
    %96 = arith.addf %93, %95 : vector<64x32xf32>
    %c0_56 = arith.constant 0 : index
    %c0_57 = arith.constant 0 : index
    %c0_58 = arith.constant 0 : index
    %97 = vector.load %arg17[%c0_56, %c0_57, %c0_58] : memref<1x64x32xf32, #tpu.memory_space<vmem>>, vector<1x64x32xf32>
    %98 = vector.shape_cast %97 : vector<1x64x32xf32> to vector<64x32xf32>
    %99 = vector.shape_cast %96 : vector<64x32xf32> to vector<1x64x32xf32>
    tpu.vector_store %arg17[%c0_56, %c0_57, %c0_58], %99 {strides = array<i32>} : memref<1x64x32xf32, #tpu.memory_space<vmem>>, vector<1x64x32xf32>,
    return
  }
  func.func @transform_0(%arg0: i32, %arg1: i32) -> (i32, i32, i32) {
    %c0_i32 = arith.constant 0 : i32
    %c0_i32_0 = arith.constant 0 : i32
    %c0_i32_1 = arith.constant 0 : i32
    return %arg0, %c0_i32, %c0_i32_0 : i32, i32, i32
  }
  func.func @transform_1(%arg0: i32, %arg1: i32) -> (i32, i32, i32) {
    %c0_i32 = arith.constant 0 : i32
    %c0_i32_0 = arith.constant 0 : i32
    %c0_i32_1 = arith.constant 0 : i32
    return %arg0, %c0_i32, %c0_i32_0 : i32, i32, i32
  }
  func.func @transform_2(%arg0: i32, %arg1: i32) -> (i32, i32) {
    %c0_i32 = arith.constant 0 : i32
    %c0_i32_0 = arith.constant 0 : i32
    %c0_i32_1 = arith.constant 0 : i32
    return %c0_i32, %c0_i32_0 : i32, i32
  }
  func.func @transform_3(%arg0: i32, %arg1: i32) -> (i32, i32) {
    %c0_i32 = arith.constant 0 : i32
    %c0_i32_0 = arith.constant 0 : i32
    %c0_i32_1 = arith.constant 0 : i32
    return %c0_i32, %c0_i32_0 : i32, i32
  }
  func.func @transform_4(%arg0: i32, %arg1: i32) -> (i32, i32) {
    %c0_i32 = arith.constant 0 : i32
    %c0_i32_0 = arith.constant 0 : i32
    %c0_i32_1 = arith.constant 0 : i32
    return %c0_i32, %c0_i32_0 : i32, i32
  }
  func.func @transform_5(%arg0: i32, %arg1: i32) -> (i32, i32) {
    %c0_i32 = arith.constant 0 : i32
    %c0_i32_0 = arith.constant 0 : i32
    %c0_i32_1 = arith.constant 0 : i32
    return %c0_i32, %c0_i32_0 : i32, i32
  }
  func.func @transform_6(%arg0: i32, %arg1: i32) -> (i32, i32) {
    %c0_i32 = arith.constant 0 : i32
    %c0_i32_0 = arith.constant 0 : i32
    %c0_i32_1 = arith.constant 0 : i32
    return %c0_i32, %c0_i32_0 : i32, i32
  }
  func.func @transform_7(%arg0: i32, %arg1: i32) -> (i32, i32) {
    %c0_i32 = arith.constant 0 : i32
    %c0_i32_0 = arith.constant 0 : i32
    %c0_i32_1 = arith.constant 0 : i32
    return %c0_i32, %c0_i32_0 : i32, i32
  }
  func.func @transform_8(%arg0: i32, %arg1: i32) -> (i32, i32) {
    %c0_i32 = arith.constant 0 : i32
    %c0_i32_0 = arith.constant 0 : i32
    %c0_i32_1 = arith.constant 0 : i32
    return %c0_i32, %c0_i32_0 : i32, i32
  }
  func.func @transform_9(%arg0: i32, %arg1: i32) -> (i32, i32) {
    %c0_i32 = arith.constant 0 : i32
    %c0_i32_0 = arith.constant 0 : i32
    %c0_i32_1 = arith.constant 0 : i32
    return %c0_i32, %c0_i32_0 : i32, i32
  }
  func.func @transform_10(%arg0: i32, %arg1: i32) -> (i32, i32) {
    %c0_i32 = arith.constant 0 : i32
    %c0_i32_0 = arith.constant 0 : i32
    %c0_i32_1 = arith.constant 0 : i32
    return %c0_i32, %c0_i32_0 : i32, i32
  }
  func.func @transform_11(%arg0: i32, %arg1: i32) -> (i32, i32) {
    %c0_i32 = arith.constant 0 : i32
    %c0_i32_0 = arith.constant 0 : i32
    %c0_i32_1 = arith.constant 0 : i32
    return %c0_i32, %c0_i32_0 : i32, i32
  }
  func.func @transform_12(%arg0: i32, %arg1: i32) -> (i32, i32) {
    %c0_i32 = arith.constant 0 : i32
    %c0_i32_0 = arith.constant 0 : i32
    %c0_i32_1 = arith.constant 0 : i32
    return %c0_i32, %c0_i32_0 : i32, i32
  }
  func.func @transform_13(%arg0: i32, %arg1: i32) -> (i32, i32) {
    %c0_i32 = arith.constant 0 : i32
    %c0_i32_0 = arith.constant 0 : i32
    %c0_i32_1 = arith.constant 0 : i32
    return %c0_i32, %c0_i32_0 : i32, i32
  }
  func.func @transform_14(%arg0: i32, %arg1: i32) -> (i32, i32) {
    %c0_i32 = arith.constant 0 : i32
    %c0_i32_0 = arith.constant 0 : i32
    %c0_i32_1 = arith.constant 0 : i32
    return %c0_i32, %c0_i32_0 : i32, i32
  }
  func.func @transform_15(%arg0: i32, %arg1: i32) -> (i32, i32, i32) {
    %c0_i32 = arith.constant 0 : i32
    %c0_i32_0 = arith.constant 0 : i32
    return %arg0, %arg1, %c0_i32 : i32, i32, i32
  }
}

</mosaic_0001>

<bundles_post_ra>
// kernel: cross_attention_2d.1
= control target key start
LH: loop header
LB: loop body
LE: loop exit
PB: predicated region body
PF: predicated region fallthrough
CT: control target
= control target key end

     0   :  { %s6828_s0 = inlined_call_operand.vmem [shape: f32[2,64,32], index: 0, kind: input, shape index: {}]   ;;  %s6829_s1 = inlined_call_operand.vmem [shape: f32[2,64,32], index: 1, kind: input, shape index: {}]   ;;  %s6830_s2 = inlined_call_operand.vmem [shape: f32[1,32], index: 2, kind: input, shape index: {}]   ;;  %s6831_s3 = inlined_call_operand.vmem [shape: f32[1,32], index: 3, kind: input, shape index: {}]   ;;  %s6832_s4 = inlined_call_operand.vmem [shape: f32[1,32], index: 4, kind: input, shape index: {}]   ;;  %s6833_s5 = inlined_call_operand.vmem [shape: f32[1,32], index: 5, kind: input, shape index: {}]   ;;  %s6834_s6 = inlined_call_operand.vmem [shape: f32[32,32], index: 6, kind: input, shape index: {}]   ;;  %s6835_s7 = inlined_call_operand.vmem [shape: f32[1,32], index: 7, kind: input, shape index: {}]   ;;  %s6836_s8 = inlined_call_operand.vmem [shape: f32[32,32], index: 8, kind: input, shape index: {}]   ;;  %s6837_s9 = inlined_call_operand.vmem [shape: f32[1,32], index: 9, kind: input, shape index: {}]   ;;  %s6838_s10 = inlined_call_operand.vmem [shape: f32[32,32], index: 10, kind: input, shape index: {}]   ;;  %s6839_s11 = inlined_call_operand.vmem [shape: f32[1,32], index: 11, kind: input, shape index: {}]   ;;  %s6840_s12 = inlined_call_operand.vmem [shape: f32[32,32], index: 12, kind: input, shape index: {}]   ;;  %s6841_s13 = inlined_call_operand.vmem [shape: f32[1,32], index: 13, kind: input, shape index: {}]   ;;  %s6842_s14 = inlined_call_operand.vmem [shape: f32[32,8], index: 14, kind: input, shape index: {}]   ;;  %s6843_s15 = inlined_call_operand.hbm [shape: f32[2,64,32], index: 15, kind: output, shape index: {}]  }
   0x1   :  { %6847 = sst [smem:[#allocation10_spill]] %s6828_s0 }
   0x2   :  { %6848 = sst [smem:[#allocation11_spill]] %s6829_s1 }
   0x3   :  { %6849 = sst [smem:[#allocation12_spill]] %s6830_s2 }
   0x4   :  { %6850 = sst [smem:[#allocation13_spill]] %s6842_s14 }
   0x5   :  { %6851 = sst [smem:[#allocation14_spill]] %s6843_s15 }
   0x6   :  { %20 = vsyncpa [#allocation7], 0 }
   0x7   :  { %22 = vsyncpa [#allocation7 + $0x1], 0  ;;  %s5685_s18 = smov 0   ;;  %s5687_s19 = smov 0  }
   0x8   :  { %s5689_s20 = smov 0   ;;  %s5691_s21 = smov 0  }
   0x9   :  { %s5693_s22 = smov 0   ;;  %s5695_s23 = smov 0  }
   0xa LB: > { %6852 = sst [smem:[#allocation9_spill]] %s5574_s18  ;;  %s4060_s24 = sadd.s32 4294967295, %s5594_s23   ;;  %s5594_s23 = sphi %s5695_s23, %s28_s23   ;;  %s5590_s22 = sphi %s5693_s22, %s6868_s22   ;;  %s5586_s21 = sphi %s5691_s21, %s6867_s21   ;;  %s5582_s20 = sphi %s5689_s20, %s6866_s20   ;;  %s5578_s19 = sphi %s5687_s19, %s6865_s19   ;;  %s5574_s18 = sphi %s5685_s18, %s6864_s18  }
   0xb   : > { %s4061_s25 = sadd.s32 4294967294, %s5594_s23   ;;  %s40_s26 = sadd.s32 1, %s5590_s22 }
   0xc   : > { %s374_s27 = sadd.s32 1, %s5582_s20  ;;  %p42_p0 = scmp.ge.s32.totalorder %s40_s26, 2 }
   0xd   : > { %p384_p1 = scmp.ne.s32.totalorder %s5582_s20, %s5578_s19  ;;  %p385_p2 = scmp.eq.s32.totalorder %s4060_s24, 1 }
   0xe   : > { %p390_p3 = scmp.ne.s32.totalorder %s5578_s19, %s5574_s18  ;;  %s6870_s26 = smov (%p42_p0, %s40_s26), 0 }
   0xf   : > { %p5725_p4 = por %p385_p2, %p384_p1  ;;  %p391_p5 = scmp.eq.s32.totalorder %s4061_s25, 1 }
  0x10   : > { %s369_s29 = ssub.s32 %s5590_s22, %s6870_s26  ;;  %p4064_p6 = scmp.ge.s32.totalorder %s5594_s23, 1 }
  0x11   : > { %p372_p7 = scmp.eq.s32.totalorder %s369_s29, 0  ;;  %p5732_p8 = por %p391_p5, %p390_p3 }
  0x12   : > { %p464_p9 = scmp.lt.s32.totalorder %s5594_s23, 3 }
  0x13   : > { %s5738_s16 = scalar_select %p372_p7, %s5582_s20, %s374_s27  }
  0x14   : > { %p465_p10 = pnand %p4064_p6, %p464_p9 }
  0x15   : > { %s6855_s14 = sld [smem:[#allocation13_spill]] (!%p465_p10)  ;;  %v5596_v3 = vmov (!%p465_p10), 0.0|0.0   ;;  %p517_p11 = scmp.lt.s32.totalorder (!%p465_p10), %s5586_s21, 1  ;;  %vm5597_vm0 = vmmov (!%p465_p10), 0   ;;  %v5598_v6 = vmov (!%p465_p10), 0.0   ;;  %vm544_vm1 = vcmask (!%p465_p10), 261120  }
  0x16   : > { %468 = sbr.rel (%p465_p10) target bundleno = 2960 (0xb90), region = 80  ;;  %4929 = vmatprep.subr.bf16.mxu0 (!%p465_p10), %v5596_v3  ;;  %4935 = vmatprep.subr.bf16.mxu1 (!%p465_p10), %v5596_v3  ;;  %s6856_s1 = sld [smem:[#allocation11_spill]] (!%p465_p10)  ;;  %vm746_vm2 = vcmask (!%p465_p10), 64512   ;;  %vm1577_vm4 = vcmask (!%p465_p10), 253952   ;;  %vm1934_vm5 = vcmask (!%p465_p10), 523264  }
  0x17   : > { %4509 = vmatprep.mubr.msk.f32.mxu0 (!%p465_p10), %vm5597_vm0, %v5598_v6  ;;  %4520 = vmatprep.mubr.msk.f32.mxu1 (!%p465_p10), %vm5597_vm0, %v5598_v6  ;;  %vm5848_vm3 = vmpackc.low (!%p465_p10), %vm746_vm2, %vm746_vm2  ;;  %s6860_s0 = sld [smem:[#allocation10_spill]] (!%p465_p10)  ;;  %s6861_s2 = sld [smem:[#allocation12_spill]] (!%p465_p10) }
  0x18   : > { %s5600_s24 = smov (!%p465_p10), 112   ;;  %s4260_s17 = sshll.u32 (!%p465_p10), %s5586_s21, 10 }
  0x1b   : > { %v528_v0 = vld [vmem:[%s6855_s14] sm:$0xff] (!%p465_p10)  ;;  %v529_v1 = vld [vmem:[%s6855_s14 + $0x8] sm:$0xff] (!%p465_p10)  ;;  %v530_v2 = vld [vmem:[%s6855_s14 + $0x10] sm:$0xff] (!%p465_p10) }
  0x1c   : > { %v5750_v4 = vpack.c.bf16 (!%p465_p10), %v529_v1, %v528_v0  ;;  %v531_v5 = vld [vmem:[%s6855_s14 + $0x18] sm:$0xff] (!%p465_p10) }
  0x1d   : > { %v5763_v7 = vpack.c.bf16 %v531_v5, %v530_v2  ;;  %s5766_s15 = scalar_select %p517_p11, %s5586_s21, 1 }
  0x1e   : > { %4931 = vmatpush3.bf16.msra.mxu0 %v5750_v4  ;;  %4937 = vmatpush3.bf16.msra.mxu1 %v5750_v4 }
  0x1f   : > { %4932 = vmatprep.subr.bf16.mxu0 %v5596_v3  ;;  %4938 = vmatprep.subr.bf16.mxu1 %v5596_v3  ;;  %s6846_s18 = sshll.u32 %s5766_s15, 6  ;;  %s6859_s27 = sshll.u32 %s5766_s15, 6 }
  0x20   : > { %s5776_s29 = scalar_lea.vmem %s6856_s1, %s6846_s18  ;;  %s5905_s25 = scalar_lea.vmem %s6860_s0, %s6859_s27 }
  0x21   : > { %v5781_v8 = vld [vmem:[%s5776_s29] sm:$0xff]  ;;  %v5784_v9 = vld [vmem:[%s5776_s29 + $0x8] sm:$0xff]  ;;  %v5787_v10 = vld [vmem:[%s5776_s29 + $0x10] sm:$0xff]  ;;  %s5599_s15 = smov 120   ;;  %s5601_s18 = smov 104  }
  0x22   : > { %4934 = vmatpush3.bf16.msra.mxu0 %v5763_v7  ;;  %4940 = vmatpush3.bf16.msra.mxu1 %v5763_v7  ;;  %v5790_v11 = vld [vmem:[%s5776_s29 + $0x18] sm:$0xff]  ;;  %v545_v12 = vsel %vm544_vm1, %v5781_v8, 0.0  ;;  %v546_v13 = vsel %vm544_vm1, %v5784_v9, 0.0  ;;  %v548_v14 = vsel %vm544_vm1, %v5787_v10, 0.0  ;;  %v566_v15 = vmul.f32 %v5781_v8, %v5781_v8  ;;  %v5803_v16 = vld [vmem:[%s5776_s29 + $0x20] sm:$0xff]  ;;  %v5812_v21 = vld [vmem:[%s5776_s29 + $0x28] sm:$0xff] }
  0x23   : > { %4941 = vmatprep.subr.bf16.mxu0 %v5596_v3  ;;  %4949 = vmatprep.subr.bf16.mxu1 %v5596_v3  ;;  %v547_v17 = vadd.f32 %v546_v13, %v545_v12  ;;  %v550_v18 = vsel %vm544_vm1, %v5790_v11, 0.0  ;;  %v567_v19 = vmul.f32 %v5784_v9, %v5784_v9  ;;  %v568_v20 = vmul.f32 %v5787_v10, %v5787_v10  ;;  %v5823_v28 = vld [vmem:[%s5776_s29 + $0x30] sm:$0xff]  ;;  %v5832_v35 = vld [vmem:[%s5776_s29 + $0x38] sm:$0xff]  ;;  %s6862_s1 = sld [smem:[#allocation14_spill]] }
  0x24   : > { %v569_v23 = vmul.f32 %v5790_v11, %v5790_v11  ;;  %v552_v24 = vsel %vm544_vm1, %v5803_v16, 0.0  ;;  %v570_v25 = vmul.f32 %v5803_v16, %v5803_v16  ;;  %v574_v26 = vsel %vm544_vm1, %v566_v15, 0.0 }
  0x25   : > { %v549_v22 = vadd.f32 %v548_v14, %v547_v17  ;;  %v575_v27 = vsel %vm544_vm1, %v567_v19, 0.0  ;;  %v577_v31 = vsel %vm544_vm1, %v568_v20, 0.0  ;;  %v554_v32 = vsel %vm544_vm1, %v5812_v21, 0.0 }
  0x26   : > { %v576_v30 = vadd.f32 %v575_v27, %v574_v26  ;;  %v571_v33 = vmul.f32 %v5812_v21, %v5812_v21  ;;  %v579_v34 = vsel %vm544_vm1, %v569_v23, 0.0  ;;  %v556_v38 = vsel %vm544_vm1, %v5823_v28, 0.0  ;;  %v948_v23 = vld [vmem:[%s6836_s8 + $0x8] sm:$0xff] }
  0x27   : > { %v551_v29 = vadd.f32 %v550_v18, %v549_v22  ;;  %v572_v39 = vmul.f32 %v5823_v28, %v5823_v28  ;;  %v581_v40 = vsel %vm544_vm1, %v570_v25, 0.0  ;;  %v558_v43 = vsel %vm544_vm1, %v5832_v35, 0.0  ;;  %v947_v22 = vld [vmem:[%s6836_s8] sm:$0xff]  ;;  %v1096_v26 = vld [vmem:[%s6838_s10 + $0x8] sm:$0xff] }
  0x28   : > { %v578_v37 = vadd.f32 %v577_v31, %v576_v30  ;;  %v573_v44 = vmul.f32 %v5832_v35, %v5832_v35  ;;  %v583_v45 = vsel %vm544_vm1, %v571_v33, 0.0  ;;  %v4957_v25 = vpack.c.bf16 %v948_v23, %v947_v22  ;;  %v950_v30 = vld [vmem:[%s6836_s8 + $0x18] sm:$0xff]  ;;  %v1097_v31 = vld [vmem:[%s6838_s10 + $0x10] sm:$0xff] }
  0x29   : > { %v553_v36 = vadd.f32 %v552_v24, %v551_v29  ;;  %v585_v48 = vsel %vm544_vm1, %v572_v39, 0.0  ;;  %v1095_v24 = vld [vmem:[%s6838_s10] sm:$0xff]  ;;  %v949_v29 = vld [vmem:[%s6836_s8 + $0x10] sm:$0xff]  ;;  %v1098_v33 = vld [vmem:[%s6838_s10 + $0x18] sm:$0xff]  ;;  %s6772_s14 = scalar_lea.hbm %s6862_s1, %s4260_s17  ;;  %s5602_s17 = smov [#allocation6]  }
  0x2a   : > { %v580_v42 = vadd.f32 %v579_v34, %v578_v37  ;;  %v587_v51 = vsel %vm544_vm1, %v573_v44, 0.0  ;;  %v4965_v27 = vpack.c.bf16 %v1096_v26, %v1095_v24  ;;  %v4969_v34 = vpack.c.bf16 %v1098_v33, %v1097_v31  ;;  %v5911_v37 = vld [vmem:[%s5905_s25 + $0x8] sm:$0xff]  ;;  %v5960_v22 = vld [vmem:[%s5905_s25 + $0x38] sm:$0xff] }
  0x2b   : > { %v555_v41 = vadd.f32 %v554_v32, %v553_v36  ;;  %v4961_v32 = vpack.c.bf16 %v950_v30, %v949_v29  ;;  %v5908_v36 = vld [vmem:[%s5905_s25] sm:$0xff]  ;;  %v1228_v39 = vsel %vm544_vm1, %v5911_v37, 0.0  ;;  %v1249_v44 = vmul.f32 %v5911_v37, %v5911_v37 }
  0x2c   : > { %v582_v47 = vadd.f32 %v581_v40, %v580_v42  ;;  %v5918_v40 = vld [vmem:[%s5905_s25 + $0x10] sm:$0xff]  ;;  %v1240_v26 = vsel %vm544_vm1, %v5960_v22, 0.0  ;;  %v1255_v33 = vmul.f32 %v5960_v22, %v5960_v22 }
  0x2d   : > { %v557_v46 = vadd.f32 %v556_v38, %v555_v41  ;;  %v1227_v38 = vsel %vm544_vm1, %v5908_v36, 0.0  ;;  %v1230_v42 = vsel %vm544_vm1, %v5918_v40, 0.0 }
  0x2e   : > { %v584_v50 = vadd.f32 %v583_v45, %v582_v47  ;;  %v1229_v41 = vadd.f32 %v1228_v39, %v1227_v38  ;;  %v5927_v45 = vld [vmem:[%s5905_s25 + $0x18] sm:$0xff]  ;;  %v918_v39 = vld [vmem:[%s6832_s4] sm:$0x1] }
  0x2f   : > { %v559_v49 = vadd.f32 %v558_v43, %v557_v46  ;;  %v1248_v43 = vmul.f32 %v5908_v36, %v5908_v36  ;;  %v1232_v47 = vsel %vm544_vm1, %v5927_v45, 0.0 }
  0x30   : > { %v586_v53 = vadd.f32 %v585_v48, %v584_v50  ;;  %v1231_v46 = vadd.f32 %v1230_v42, %v1229_v41  ;;  %v1250_v48 = vmul.f32 %v5918_v40, %v5918_v40  ;;  %v1257_v50 = vsel %vm544_vm1, %v1249_v44, 0.0 }
  0x31   : > { %v560_v52 = vrot.slane %v559_v49, 4 }
  0x32   : > { %v588_v55 = vadd.f32 %v587_v51, %v586_v53  ;;  %v5936_v51 = vld [vmem:[%s5905_s25 + $0x20] sm:$0xff] }
  0x33   : > { %v561_v54 = vadd.f32 %v560_v52, %v559_v49  ;;  %v1256_v49 = vsel %vm544_vm1, %v1248_v43, 0.0  ;;  %v1233_v52 = vadd.f32 %v1232_v47, %v1231_v46  ;;  %v1269_v43 = vsel %vm544_vm1, %v1255_v33, 0.0 }
  0x34   : > { %v589_v57 = vrot.slane %v588_v55, 4  ;;  %v1258_v53 = vadd.f32 %v1257_v50, %v1256_v49 }
  0x35   : > { %v562_v56 = vrot.slane %v561_v54, 2 }
  0x36   : > { %v590_v59 = vadd.f32 %v589_v57, %v588_v55  ;;  %v1234_v55 = vsel %vm544_vm1, %v5936_v51, 0.0  ;;  %v1259_v57 = vsel %vm544_vm1, %v1250_v48, 0.0 }
  0x37   : > { %v563_v58 = vadd.f32 %v562_v56, %v561_v54  ;;  %v1251_v56 = vmul.f32 %v5927_v45, %v5927_v45 }
  0x38   : > { %v591_v61 = vrot.slane %v590_v59, 2 }
  0x39   : > { %v564_v60 = vrot.slane %v563_v58, 1 }
  0x3a   : > { %v592_v63 = vadd.f32 %v591_v61, %v590_v59  ;;  %v5944_v59 = vld [vmem:[%s5905_s25 + $0x28] sm:$0xff]  ;;  %v1260_v61 = vadd.f32 %v1259_v57, %v1258_v53 }
  0x3b   : > { %v565_v62 = vadd.f32 %v564_v60, %v563_v58  ;;  %v1235_v60 = vadd.f32 %v1234_v55, %v1233_v52  ;;  %v4082_v55 = vld [vmem:[%s6833_s5] ss:$0 sm:$0xff] }
  0x3c   : > { %v593_v1 = vrot.slane %v592_v63, 1 }
  0x3d   : > { %4510 = vmatmul.mubr.msk.f32.vlgmr.msra.gmra.mrb[0].mxu0 %vm544_vm1, %v565_v62  ;;  %v1236_v62 = vsel %vm544_vm1, %v5944_v59, 0.0 }
  0x3e   : > { %4944 = vmatpush3.bf16.xpose.msk.msra.mxu0 %vm5848_vm3, %v5750_v4  ;;  %4531 = vmatprep.mubr.msk.f32.mxu0 %vm5597_vm0, %v5598_v6  ;;  %v594_v2 = vadd.f32 %v593_v1, %v592_v63  ;;  %v1252_v63 = vmul.f32 %v5936_v51, %v5936_v51  ;;  %v1261_v1 = vsel %vm544_vm1, %v1251_v56, 0.0 }
  0x3f   : > { %4945 = vmatprep.subr.bf16.mxu0 %v5596_v3 }
  0x40   : > { %4521 = vmatmul.mubr.msk.f32.vlgmr.msra.gmra.mrb[0].mxu1 %vm544_vm1, %v594_v2  ;;  %v5952_v2 = vld [vmem:[%s5905_s25 + $0x30] sm:$0xff] }
  0x41   : > { %4952 = vmatpush3.bf16.xpose.msk.msra.mxu1 %vm5848_vm3, %v5750_v4  ;;  %4542 = vmatprep.mubr.msk.f32.mxu1 %vm5597_vm0, %v5598_v6 }
  0x42   : > { %4953 = vmatprep.subr.bf16.mxu1 %v5596_v3 }
  0x46   : > { %4948 = vmatpush3.bf16.xpose.msk.msra.mxu0 %vm5848_vm3, %v5763_v7 }
  0x47   : > { %4958 = vmatprep.subr.bf16.mxu0 %v4957_v25 }
  0x49   : > { %4956 = vmatpush3.bf16.xpose.msk.msra.mxu1 %vm5848_vm3, %v5763_v7 }
  0x4a   : > { %4966 = vmatprep.subr.bf16.mxu1 %v4965_v27 }
 0x110   : > { %v664_v5 = vpop.f32.mrb[0].mxu0 }
 0x111   : > { %v741_v12 = vmul.f32 0.00390625, %v664_v5  ;;  %v4511_v13 = vpop.f32.mrb[1].mxu0  ;;  %v906_v5 = vlaneseq }
 0x112   : > { %v1262_v13 = vadd.f32 %v1261_v1, %v1260_v61 }
 0x113   : > { %v743_v14 = vmul.f32 %v741_v12, %v741_v12  ;;  %4532 = vmatmul.mubr.msk.f32.vlgmr.msra.gmra.mrb[2].mxu0 %vm746_vm2, %v741_v12  ;;  %v737_v15 = vpop.f32.mrb[0].mxu1  ;;  %v1237_v12 = vadd.f32 %v1236_v62, %v1235_v60  ;;  %v907_v23 = vshrl.u32 %v906_v5, 7 }
 0x114   : > { %v742_v17 = vmul.f32 0.00390625, %v737_v15  ;;  %v4522_v18 = vpop.f32.mrb[1].mxu1  ;;  %4960 = vmatpush3.bf16.msra.mxu0 %v4957_v25  ;;  %v1238_v15 = vsel %vm544_vm1, %v5952_v2, 0.0 }
 0x115   : > { %4962 = vmatprep.subr.bf16.mxu0 %v4961_v32  ;;  %v1263_v18 = vsel %vm544_vm1, %v1252_v63, 0.0  ;;  %v1239_v24 = vadd.f32 %v1238_v15, %v1237_v12  ;;  %v908_v30 = vsub.s32 0, %v907_v23 }
 0x116   : > { %v744_v19 = vsub.f32 %v742_v17, %v743_v14  ;;  %v1253_v17 = vmul.f32 %v5944_v59, %v5944_v59  ;;  %v1264_v25 = vadd.f32 %v1263_v18, %v1262_v13 }
 0x117   : > { %v1241_v31 = vadd.f32 %v1240_v26, %v1239_v24 }
 0x118   : > { %v745_v20 = vmax.f32 %v744_v19, 0.0  ;;  %4964 = vmatpush3.bf16.msra.mxu0 %v4961_v32  ;;  %v1265_v29 = vsel %vm544_vm1, %v1253_v17, 0.0 }
 0x119   : > { %4973 = vmatprep.subr.bf16.mxu0 %v5596_v3  ;;  %v1266_v32 = vadd.f32 %v1265_v29, %v1264_v25  ;;  %v1242_v41 = vrot.slane %v1241_v31, 4  ;;  %v1623_v29 = vld [vmem:[%s6834_s6] sm:$0xff] }
 0x11a   : > { %4543 = vmatmul.mubr.msk.f32.vlgmr.msra.gmra.mrb[2].mxu1 %vm746_vm2, %v745_v20 }
 0x11b   : > { %4968 = vmatpush3.bf16.msra.mxu1 %v4965_v27  ;;  %v1254_v27 = vmul.f32 %v5952_v2, %v5952_v2  ;;  %v1243_v48 = vadd.f32 %v1242_v41, %v1241_v31 }
 0x11c   : > { %4970 = vmatprep.subr.bf16.mxu1 %v4969_v34 }
 0x11f   : > { %4972 = vmatpush3.bf16.msra.mxu1 %v4969_v34  ;;  %v1267_v34 = vsel %vm544_vm1, %v1254_v27, 0.0 }
 0x120   : > { %4993 = vmatprep.subr.bf16.mxu1 %v5596_v3  ;;  %v1268_v42 = vadd.f32 %v1267_v34, %v1266_v32 }
 0x122   : > { %v1270_v49 = vadd.f32 %v1269_v43, %v1268_v42 }
 0x1e6   : > { %v828_v54 = vpop.f32.mrb[2].mxu0 }
 0x1e7   : > { %v4533_v58 = vpop.f32.mrb[3].mxu0  ;;  %v909_v38 = vrot.slane %v828_v54, %v908_v30 }
 0x1e9   : > { %v910_v47 = vsub.f32 %v5781_v8, %v909_v38  ;;  %v911_v52 = vsub.f32 %v5784_v9, %v909_v38  ;;  %v912_v53 = vsub.f32 %v5787_v10, %v909_v38  ;;  %v913_v54 = vsub.f32 %v5790_v11, %v909_v38 }
 0x1ea   : > { %v914_v56 = vsub.f32 %v5803_v16, %v909_v38  ;;  %v915_v57 = vsub.f32 %v5812_v21, %v909_v38  ;;  %v916_v58 = vsub.f32 %v5823_v28, %v909_v38  ;;  %v917_v8 = vsub.f32 %v5832_v35, %v909_v38 }
 0x1eb   : > { %v1244_v21 = vrot.slane %v1243_v48, 2  ;;  %v1271_v28 = vrot.slane %v1270_v49, 4 }
 0x1ed   : > { %v901_v14 = vpop.f32.mrb[2].mxu1  ;;  %v1272_v15 = vadd.f32 %v1271_v28, %v1270_v49  ;;  %v1625_v28 = vld [vmem:[%s6834_s6 + $0x10] sm:$0xff] }
 0x1ee   : > { %v902_v19 = vadd.f32 1e-05, %v901_v14  ;;  %v4544_v20 = vpop.f32.mrb[3].mxu1  ;;  %v1245_v14 = vadd.f32 %v1244_v21, %v1243_v48 }
 0x1ef   : > { %v1273_v20 = vrot.slane %v1272_v15, 2 }
 0x1f0   : > { %5376 = vrsqrt.f32 %v902_v19  ;;  %v1246_v19 = vrot.slane %v1245_v14, 1 }
 0x1f1   : > { %v1274_v25 = vadd.f32 %v1273_v20, %v1272_v15 }
 0x1f2   : > { %v1247_v24 = vadd.f32 %v1246_v19, %v1245_v14 }
 0x1f3   : > { %v1275_v26 = vrot.slane %v1274_v25, 1 }
 0x1f5   : > { %v1276_v27 = vadd.f32 %v1275_v26, %v1274_v25 }
 0x1fa   : > { %v5377_v44 = vpop.eup %5376 }
 0x1fb   : > { %v919_v46 = vmul.f32 %v5377_v44, %v918_v39 }
 0x1fd   : > { %v923_v50 = vrot.slane %v919_v46, %v908_v30  ;;  %v1624_v30 = vld [vmem:[%s6834_s6 + $0x8] sm:$0xff] }
 0x1fe   : > { %v6039_v31 = vpack.c.bf16 %v1624_v30, %v1623_v29 }
 0x1ff   : > { %v924_v60 = vmul.f32 %v923_v50, %v910_v47  ;;  %v925_v61 = vmul.f32 %v923_v50, %v911_v52  ;;  %v926_v62 = vmul.f32 %v923_v50, %v912_v53  ;;  %v927_v9 = vmul.f32 %v923_v50, %v913_v54 }
 0x200   : > { %v928_v63 = vmul.f32 %v923_v50, %v914_v56  ;;  %v929_v10 = vmul.f32 %v923_v50, %v915_v57  ;;  %v930_v1 = vmul.f32 %v923_v50, %v916_v58  ;;  %v931_v11 = vmul.f32 %v923_v50, %v917_v8 }
 0x201   : > { %v939_v5 = vadd.f32 %v4082_v55, %v924_v60  ;;  %v940_v12 = vadd.f32 %v4082_v55, %v925_v61  ;;  %v941_v16 = vadd.f32 %v4082_v55, %v926_v62  ;;  %v942_v35 = vadd.f32 %v4082_v55, %v927_v9 }
 0x202   : > { %v943_v13 = vadd.f32 %v4082_v55, %v928_v63  ;;  %v944_v17 = vadd.f32 %v4082_v55, %v929_v10  ;;  %v945_v18 = vadd.f32 %v4082_v55, %v930_v1  ;;  %v946_v23 = vadd.f32 %v4082_v55, %v931_v11 }
 0x203   : > { %4553 = vmatprep.mubr.msk.f32.mxu0 %vm544_vm1, %v939_v5  ;;  %4573 = vmatprep.mubr.msk.f32.mxu1 %vm544_vm1, %v939_v5 }
 0x204   : > { %4554 = vmatmul.mubr.msk.f32.vlgmr.msra.gmra.mrb[4].mxu0 %vm544_vm1, %v940_v12  ;;  %4574 = vmatmul.mubr.msk.f32.vlgmr.msra.gmra.mrb[4].mxu1 %vm544_vm1, %v940_v12 }
 0x205   : > { %4556 = vmatprep.mubr.msk.f32.mxu0 %vm544_vm1, %v941_v16  ;;  %4576 = vmatprep.mubr.msk.f32.mxu1 %vm544_vm1, %v941_v16 }
 0x206   : > { %4975 = vmatpush3.bf16.msra.mxu0 %v5750_v4  ;;  %4996 = vmatpush3.bf16.xpose.msk.msra.mxu1 %vm5848_vm3, %v5750_v4 }
 0x207   : > { %4976 = vmatprep.subr.bf16.mxu0 %v5596_v3  ;;  %4997 = vmatprep.subr.bf16.mxu1 %v5596_v3 }
 0x208   : > { %4557 = vmatmul.mubr.msk.f32.gmra.mrb[6].mxu0 %vm544_vm1, %v942_v35  ;;  %4577 = vmatmul.mubr.msk.f32.gmra.mrb[6].mxu1 %vm544_vm1, %v942_v35  ;;  %v1626_v35 = vld [vmem:[%s6834_s6 + $0x18] sm:$0xff] }
 0x209   : > { %4559 = vmatprep.mubr.msk.f32.mxu0 %vm544_vm1, %v943_v13  ;;  %4579 = vmatprep.mubr.msk.f32.mxu1 %vm544_vm1, %v943_v13 }
 0x20a   : > { %4978 = vmatpush3.bf16.msra.mxu0 %v5763_v7 }
 0x20b   : > { %4979 = vmatprep.subr.bf16.mxu0 %v5596_v3 }
 0x20c   : > { %4560 = vmatmul.mubr.msk.f32.gmra.mrb[8].mxu0 %vm544_vm1, %v944_v17  ;;  %4580 = vmatmul.mubr.msk.f32.gmra.mrb[8].mxu1 %vm544_vm1, %v944_v17 }
 0x20d   : > { %4562 = vmatprep.mubr.msk.f32.mxu0 %vm544_vm1, %v945_v18  ;;  %4582 = vmatprep.mubr.msk.f32.mxu1 %vm544_vm1, %v945_v18 }
 0x20e   : > { %5000 = vmatpush3.bf16.xpose.msk.msra.mxu1 %vm5848_vm3, %v5763_v7 }
 0x210   : > { %4563 = vmatmul.mubr.msk.f32.gmra.mrb[10].mxu0 %vm544_vm1, %v946_v23  ;;  %4583 = vmatmul.mubr.msk.f32.gmra.mrb[10].mxu1 %vm544_vm1, %v946_v23 }
 0x211   : > { %4593 = vmatprep.mubr.msk.f32.mxu0 %vm5597_vm0, %v5598_v6  ;;  %4626 = vmatprep.mubr.msk.f32.mxu1 %vm5597_vm0, %v5598_v6 }
 0x214   : > { %4594 = vmatmul.mubr.msk.f32.vlgmr.msra.gmra.mrb[12].mxu0 %vm544_vm1, %v1247_v24  ;;  %v5005_v24 = vpack.c.bf16 %v1626_v35, %v1625_v28 }
 0x215   : > { %4981 = vmatpush3.bf16.msra.mxu0 %v5750_v4  ;;  %4604 = vmatprep.mubr.msk.f32.mxu0 %vm5597_vm0, %v5598_v6 }
 0x216   : > { %4982 = vmatprep.subr.bf16.mxu0 %v5596_v3 }
 0x219   : > { %4984 = vmatpush3.bf16.msra.mxu0 %v5763_v7 }
 0x21a   : > { %4985 = vmatprep.subr.bf16.mxu0 %v5596_v3 }
 0x21c   : > { %4605 = vmatmul.mubr.msk.f32.vlgmr.msra.gmra.mrb[14].mxu0 %vm544_vm1, %v1276_v27 }
 0x21d   : > { %4615 = vmatprep.mubr.msk.f32.mxu0 %vm5597_vm0, %v5598_v6 }
 0x222   : > { %4988 = vmatpush3.bf16.xpose.msk.msra.mxu0 %vm5848_vm3, %v5750_v4  ;;  %v4092_v4 = vld [vmem:[%s6839_s11] ss:$0 sm:$0xff] }
 0x223   : > { %4989 = vmatprep.subr.bf16.mxu0 %v5596_v3  ;;  %v4083_v3 = vld [vmem:[%s6837_s9] ss:$0 sm:$0xff] }
 0x22a   : > { %4992 = vmatpush3.bf16.xpose.msk.msra.mxu0 %vm5848_vm3, %v5763_v7 }
 0x22b   : > { %5002 = vmatprep.subr.bf16.mxu0 %v6039_v31 }
 0x2d7   : > { %v4555_v6 = vpop.f32.mrb[4].mxu0  ;;  %v4575_v7 = vpop.f32.mrb[4].mxu1 }
 0x2d8   : > { %v1054_v32 = vadd.f32 %v4555_v6, %v4083_v3  ;;  %v1178_v33 = vadd.f32 %v4575_v7, %v4092_v4  ;;  %v1048_v34 = vpop.f32.mrb[5].mxu0  ;;  %v1172_v38 = vpop.f32.mrb[5].mxu1 }
 0x2d9   : > { %v1049_v39 = vadd.f32 %v4083_v3, %v1048_v34  ;;  %v1173_v41 = vadd.f32 %v4092_v4, %v1172_v38 }
 0x2da   : > { %1088 = vst.msk [vmem:[#allocation2 + $0x8] sm:$0xff] %vm544_vm1, %v1054_v32  ;;  %1212 = vst.msk [vmem:[#allocation3 + $0x8] sm:$0xff] %vm544_vm1, %v1178_v33 }
 0x2db   : > { %1087 = vst.msk [vmem:[#allocation2] sm:$0xff] %vm544_vm1, %v1049_v39  ;;  %1211 = vst.msk [vmem:[#allocation3] sm:$0xff] %vm544_vm1, %v1173_v41  ;;  %v4558_v42 = vpop.f32.mrb[6].mxu0  ;;  %v4578_v43 = vpop.f32.mrb[6].mxu1 }
 0x2dc   : > { %v1064_v44 = vadd.f32 %v4558_v42, %v4083_v3  ;;  %v1188_v46 = vadd.f32 %v4578_v43, %v4092_v4  ;;  %v1058_v47 = vpop.f32.mrb[7].mxu0  ;;  %v1182_v48 = vpop.f32.mrb[7].mxu1 }
 0x2dd   : > { %v1059_v49 = vadd.f32 %v4083_v3, %v1058_v47  ;;  %v1183_v50 = vadd.f32 %v4092_v4, %v1182_v48 }
 0x2de   : > { %1090 = vst.msk [vmem:[#allocation2 + $0x18] sm:$0xff] %vm544_vm1, %v1064_v44  ;;  %1214 = vst.msk [vmem:[#allocation3 + $0x18] sm:$0xff] %vm544_vm1, %v1188_v46 }
 0x2df   : > { %1089 = vst.msk [vmem:[#allocation2 + $0x10] sm:$0xff] %vm544_vm1, %v1059_v49  ;;  %1213 = vst.msk [vmem:[#allocation3 + $0x10] sm:$0xff] %vm544_vm1, %v1183_v50  ;;  %v4561_v52 = vpop.f32.mrb[8].mxu0  ;;  %v4581_v53 = vpop.f32.mrb[8].mxu1 }
 0x2e0   : > { %v1074_v54 = vadd.f32 %v4561_v52, %v4083_v3  ;;  %v1198_v55 = vadd.f32 %v4581_v53, %v4092_v4  ;;  %v1068_v56 = vpop.f32.mrb[9].mxu0  ;;  %v1192_v57 = vpop.f32.mrb[9].mxu1 }
 0x2e1   : > { %v1069_v58 = vadd.f32 %v4083_v3, %v1068_v56  ;;  %v1193_v8 = vadd.f32 %v4092_v4, %v1192_v57  ;;  %v1765_v60 = vld [vmem:[#allocation2 + $0x8] sm:$0xff] }
 0x2e2   : > { %v1773_v61 = vld [vmem:[#allocation3 + $0x8] sm:$0xff]  ;;  %1092 = vst.msk [vmem:[#allocation2 + $0x28] sm:$0xff] %vm544_vm1, %v1074_v54  ;;  %1216 = vst.msk [vmem:[#allocation3 + $0x28] sm:$0xff] %vm544_vm1, %v1198_v55  ;;  %v1764_v62 = vld [vmem:[#allocation2] sm:$0xff] }
 0x2e3   : > { %v1772_v9 = vld [vmem:[#allocation3] sm:$0xff]  ;;  %1091 = vst.msk [vmem:[#allocation2 + $0x20] sm:$0xff] %vm544_vm1, %v1069_v58  ;;  %1215 = vst.msk [vmem:[#allocation3 + $0x20] sm:$0xff] %vm544_vm1, %v1193_v8  ;;  %v4564_v63 = vpop.f32.mrb[10].mxu0  ;;  %v4584_v10 = vpop.f32.mrb[10].mxu1  ;;  %v6060_v1 = vpack.i.bf16 %v1765_v60, %v1764_v62  ;;  %v5009_v11 = vpack.c.bf16 %v1765_v60, %v1764_v62 }
 0x2e4   : > { %v1084_v5 = vadd.f32 %v4564_v63, %v4083_v3  ;;  %v1208_v12 = vadd.f32 %v4584_v10, %v4092_v4  ;;  %v1078_v16 = vpop.f32.mrb[11].mxu0  ;;  %v1202_v21 = vpop.f32.mrb[11].mxu1  ;;  %v6068_v13 = vpack.i.bf16 %v1773_v61, %v1772_v9  ;;  %v5033_v38 = vpack.c.bf16 %v1773_v61, %v1772_v9  ;;  %v1575_v8 = vld [vmem:[%s6861_s2] sm:$0x1] }
 0x2e5   : > { %v1079_v14 = vadd.f32 %v4083_v3, %v1078_v16  ;;  %v1203_v15 = vadd.f32 %v4092_v4, %v1202_v21  ;;  %5257 = vrot.lane.b32.xlu1 %v6060_v1, %s5599_s15  ;;  %5011 = vmatprep.subr.msk.bf16.mxu1 %vm5848_vm3, %v5009_v11  ;;  %v1767_v17 = vld [vmem:[#allocation2 + $0x18] sm:$0xff]  ;;  %v1579_v62 = vld [vmem:[%s6831_s3] sm:$0x1] }
 0x2e6   : > { %v6074_v18 = vld [vmem:[#allocation3 + $0x18] sm:$0xff]  ;;  %1094 = vst.msk [vmem:[#allocation2 + $0x38] sm:$0xff] %vm544_vm1, %v1084_v5  ;;  %1218 = vst.msk [vmem:[#allocation3 + $0x38] sm:$0xff] %vm544_vm1, %v1208_v12  ;;  %v1766_v19 = vld [vmem:[#allocation2 + $0x10] sm:$0xff] }
 0x2e7   : > { %v6078_v20 = vld [vmem:[#allocation3 + $0x10] sm:$0xff]  ;;  %1093 = vst.msk [vmem:[#allocation2 + $0x30] sm:$0xff] %vm544_vm1, %v1079_v14  ;;  %1217 = vst.msk [vmem:[#allocation3 + $0x30] sm:$0xff] %vm544_vm1, %v1203_v15  ;;  %v1346_v23 = vpop.f32.mrb[12].mxu0  ;;  %v6082_v25 = vpack.i.bf16 %v1767_v17, %v1766_v19  ;;  %v5015_v50 = vpack.c.bf16 %v1767_v17, %v1766_v19 }
 0x2e8   : > { %v1423_v26 = vmul.f32 0.00390625, %v1346_v23  ;;  %v4595_v27 = vpop.f32.mrb[13].mxu0  ;;  %v6086_v29 = vpack.i.bf16 %v6074_v18, %v6078_v20  ;;  %v5037_v14 = vpack.c.bf16 %v6074_v18, %v6078_v20 }
 0x2e9   : > { %v1769_v30 = vld [vmem:[#allocation2 + $0x28] sm:$0xff] }
 0x2ea   : > { %v6088_v3 = vld [vmem:[#allocation3 + $0x28] sm:$0xff]  ;;  %4616 = vmatmul.mubr.msk.f32.vlgmr.msra.gmra.mrb[16].mxu0 %vm746_vm2, %v1423_v26  ;;  %v1768_v4 = vld [vmem:[#allocation2 + $0x20] sm:$0xff]  ;;  %v1425_v42 = vmul.f32 %v1423_v26, %v1423_v26 }
 0x2eb   : > { %v6091_v6 = vld [vmem:[#allocation3 + $0x20] sm:$0xff]  ;;  %5004 = vmatpush3.bf16.msra.mxu0 %v6039_v31  ;;  %v6094_v7 = vpack.i.bf16 %v1769_v30, %v1768_v4  ;;  %v5021_v52 = vpack.c.bf16 %v1769_v30, %v1768_v4 }
 0x2ec   : > { %5006 = vmatprep.subr.bf16.mxu0 %v5005_v24  ;;  %v6098_v32 = vpack.i.bf16 %v6088_v3, %v6091_v6 }
 0x2ed   : > { %v1771_v33 = vld [vmem:[#allocation2 + $0x38] sm:$0xff] }
 0x2ee   : > { %v6100_v34 = vld [vmem:[#allocation3 + $0x38] sm:$0xff]  ;;  %v1770_v39 = vld [vmem:[#allocation2 + $0x30] sm:$0xff] }
 0x2ef   : > { %v6102_v41 = vld [vmem:[#allocation3 + $0x30] sm:$0xff]  ;;  %v1419_v43 = vpop.f32.mrb[14].mxu0  ;;  %5008 = vmatpush3.bf16.msra.mxu0 %v5005_v24  ;;  %v6104_v44 = vpack.i.bf16 %v1771_v33, %v1770_v39  ;;  %v5027_v53 = vpack.c.bf16 %v1771_v33, %v1770_v39 }
 0x2f0   : > { %v1424_v31 = vmul.f32 0.00390625, %v1419_v43  ;;  %v4606_v46 = vpop.f32.mrb[15].mxu0  ;;  %5034 = vmatprep.subr.bf16.mxu0 %v5033_v38  ;;  %v6108_v47 = vpack.i.bf16 %v6100_v34, %v6102_v41  ;;  %v5045_v26 = vpack.c.bf16 %v6100_v34, %v6102_v41 }
 0x2f2   : > { %v1426_v48 = vsub.f32 %v1424_v31, %v1425_v42 }
 0x2f4   : > { %v1427_v49 = vmax.f32 %v1426_v48, 0.0 }
 0x2f6   : > { %4627 = vmatmul.mubr.msk.f32.vlgmr.msra.gmra.mrb[12].mxu1 %vm746_vm2, %v1427_v49 }
 0x2f7   : > { %5014 = vmatpush3.bf16.xpose.msk.msra.mxu1 %vm5848_vm3, %v5009_v11 }
 0x2f8   : > { %5017 = vmatprep.subr.msk.bf16.mxu1 %vm5848_vm3, %v5015_v50 }
 0x2ff   : > { %5020 = vmatpush3.bf16.xpose.msk.msra.mxu1 %vm5848_vm3, %v5015_v50 }
 0x300   : > { %5023 = vmatprep.subr.msk.bf16.mxu1 %vm5848_vm3, %v5021_v52 }
 0x307   : > { %5026 = vmatpush3.bf16.xpose.msk.msra.mxu1 %vm5848_vm3, %v5021_v52 }
 0x308   : > { %5029 = vmatprep.subr.msk.bf16.mxu1 %vm5848_vm3, %v5027_v53 }
 0x30f   : > { %5032 = vmatpush3.bf16.xpose.msk.msra.mxu1 %vm5848_vm3, %v5027_v53 }
 0x357   : > { %v5258_v23 = vpop.permute.xlu1 %5257 }
 0x358   : > { %v5259_v24 = vunpack.i.l.bf16 %v5258_v23 }
 0x3bd   : > { %v1497_v54 = vpop.f32.mrb[16].mxu0 }
 0x3be   : > { %v4617_v55 = vpop.f32.mrb[17].mxu0 }
 0x3c9   : > { %v1570_v56 = vpop.f32.mrb[12].mxu1 }
 0x3ca   : > { %v1571_v57 = vadd.f32 1e-05, %v1570_v56  ;;  %v4628_v58 = vpop.f32.mrb[13].mxu1 }
 0x3cc   : > { %5378 = vrsqrt.f32 %v1571_v57 }
 0x3d6   : > { %v5379_v60 = vpop.eup %5378 }
 0x3d7   : > { %v1576_v61 = vmul.f32 %v5379_v60, %v1575_v8 }
 0x3d9   : > { %1578 = vst.msk [vmem:[#allocation4] sm:$0x1] %vm1577_vm4, %v1576_v61  ;;  %v1580_v9 = vmul.f32 %v1576_v61, %v1497_v54 }
 0x3db   : > { %v1581_v63 = vsub.f32 %v1579_v62, %v1580_v9 }
 0x3dd   : > { %1582 = vst.msk [vmem:[#allocation5] sm:$0x1] %vm1577_vm4, %v1581_v63 }
 0x3e0   : > { %v4113_v10 = vld [vmem:[#allocation4] ss:$0 sm:$0xff] }
 0x3e1   : > { %v1600_v11 = vmul.f32 %v4113_v10, %v5908_v36  ;;  %v1601_v5 = vmul.f32 %v4113_v10, %v5911_v37  ;;  %v1602_v28 = vmul.f32 %v4113_v10, %v5918_v40  ;;  %v1603_v15 = vmul.f32 %v4113_v10, %v5927_v45 }
 0x3e2   : > { %v1604_v36 = vmul.f32 %v4113_v10, %v5936_v51  ;;  %v5041_v40 = vpack.c.bf16 %v6088_v3, %v6091_v6  ;;  %v1605_v19 = vmul.f32 %v4113_v10, %v5944_v59  ;;  %v1606_v45 = vmul.f32 %v4113_v10, %v5952_v2  ;;  %v4115_v2 = vld [vmem:[%s6835_s7] ss:$0 sm:$0xff] }
 0x3e3   : > { %v5260_v51 = vunpack.i.h.bf16 %v5258_v23  ;;  %v1607_v27 = vmul.f32 %v4113_v10, %v5960_v22 }
 0x3e4   : > { %v4114_v12 = vld [vmem:[#allocation5] ss:$0 sm:$0xff] }
 0x3e5   : > { %v1615_v16 = vadd.f32 %v4114_v12, %v1600_v11  ;;  %v1616_v21 = vadd.f32 %v4114_v12, %v1601_v5  ;;  %v1617_v35 = vadd.f32 %v4114_v12, %v1602_v28  ;;  %v1618_v37 = vadd.f32 %v4114_v12, %v1603_v15 }
 0x3e6   : > { %v1619_v17 = vadd.f32 %v4114_v12, %v1604_v36  ;;  %v1620_v18 = vadd.f32 %v4114_v12, %v1605_v19  ;;  %v1621_v20 = vadd.f32 %v4114_v12, %v1606_v45  ;;  %v1622_v59 = vadd.f32 %v4114_v12, %v1607_v27 }
 0x3e7   : > { %4637 = vmatprep.mubr.msk.f32.mxu0 %vm544_vm1, %v1615_v16  ;;  %v6152_v30 = vpack.c.bf16 %v5260_v51, %v5259_v24 }
 0x3e8   : > { %4638 = vmatmul.mubr.msk.f32.vlgmr.msra.gmra.mrb[18].mxu0 %vm544_vm1, %v1616_v21 }
 0x3e9   : > { %5036 = vmatpush3.bf16.msra.mxu0 %v5033_v38  ;;  %4640 = vmatprep.mubr.msk.f32.mxu0 %vm544_vm1, %v1617_v35 }
 0x3ea   : > { %5038 = vmatprep.subr.bf16.mxu0 %v5037_v14 }
 0x3ec   : > { %4641 = vmatmul.mubr.msk.f32.gmra.mrb[20].mxu0 %vm544_vm1, %v1618_v37 }
 0x3ed   : > { %5040 = vmatpush3.bf16.msra.mxu0 %v5037_v14  ;;  %4643 = vmatprep.mubr.msk.f32.mxu0 %vm544_vm1, %v1619_v17 }
 0x3ee   : > { %5042 = vmatprep.subr.bf16.mxu0 %v5041_v40 }
 0x3f0   : > { %4644 = vmatmul.mubr.msk.f32.gmra.mrb[22].mxu0 %vm544_vm1, %v1620_v18 }
 0x3f1   : > { %5044 = vmatpush3.bf16.msra.mxu0 %v5041_v40  ;;  %4646 = vmatprep.mubr.msk.f32.mxu0 %vm544_vm1, %v1621_v20 }
 0x3f2   : > { %5046 = vmatprep.subr.bf16.mxu0 %v5045_v26 }
 0x3f4   : > { %4647 = vmatmul.mubr.msk.f32.gmra.mrb[24].mxu0 %vm544_vm1, %v1622_v59 }
 0x3f5   : > { %5048 = vmatpush3.bf16.msra.mxu0 %v5045_v26 }
 0x3f6   : > { %5051 = vmatprep.subr.msk.bf16.mxu0 %vm5848_vm3, %v6152_v30 }
 0x4bb   : > { %v4639_v3 = vpop.f32.mrb[18].mxu0 }
 0x4bc   : > { %v1725_v22 = vpop.f32.mrb[19].mxu0  ;;  %v6163_v6 = vadd.f32 %v4639_v3, %v4115_v2 }
 0x4bd   : > { %v6161_v4 = vadd.f32 %v4115_v2, %v1725_v22 }
 0x4bf   : > { %v4642_v33 = vpop.f32.mrb[20].mxu0  ;;  %4665 = vmatprep.mubr.msk.f32.mxu1 %vm746_vm2, %v6161_v4 }
 0x4c0   : > { %v1735_v34 = vpop.f32.mrb[21].mxu0  ;;  %4666 = vmatmul.mubr.msk.f32.vlgmr.msra.gmra.mrb[14].mxu1 %vm746_vm2, %v6163_v6  ;;  %v6171_v39 = vadd.f32 %v4642_v33, %v4115_v2 }
 0x4c1   : > { %v6169_v38 = vadd.f32 %v4115_v2, %v1735_v34 }
 0x4c3   : > { %v4645_v41 = vpop.f32.mrb[22].mxu0  ;;  %4668 = vmatprep.mubr.msk.f32.mxu1 %vm746_vm2, %v6169_v38 }
 0x4c4   : > { %v1745_v42 = vpop.f32.mrb[23].mxu0  ;;  %4669 = vmatmul.mubr.msk.f32.gmra.mrb[16].mxu1 %vm746_vm2, %v6171_v39  ;;  %v6179_v31 = vadd.f32 %v4645_v41, %v4115_v2 }
 0x4c5   : > { %v6177_v43 = vadd.f32 %v4115_v2, %v1745_v42 }
 0x4c7   : > { %v4648_v46 = vpop.f32.mrb[24].mxu0  ;;  %4671 = vmatprep.mubr.msk.f32.mxu1 %vm746_vm2, %v6177_v43 }
 0x4c8   : > { %v1755_v48 = vpop.f32.mrb[25].mxu0  ;;  %4672 = vmatmul.mubr.msk.f32.gmra.mrb[18].mxu1 %vm746_vm2, %v6179_v31  ;;  %v6187_v50 = vadd.f32 %v4648_v46, %v4115_v2 }
 0x4c9   : > { %v6185_v49 = vadd.f32 %v4115_v2, %v1755_v48 }
 0x4cb   : > { %4674 = vmatprep.mubr.msk.f32.mxu1 %vm746_vm2, %v6185_v49 }
 0x4cc   : > { %4675 = vmatmul.mubr.msk.f32.gmra.mrb[20].mxu1 %vm746_vm2, %v6187_v50 }
 0x593   : > { %v4667_v52 = vpop.f32.mrb[14].mxu1 }
 0x594   : > { %v1895_v53 = vpop.f32.mrb[15].mxu1  ;;  %v1938_v54 = vsel %vm1934_vm5, %v4667_v52, -inf }
 0x595   : > { %1939 = vmax.xlane.f32.xlu0 %v1938_v54  ;;  %v1935_v57 = vsel %vm1934_vm5, %v1895_v53, -inf }
 0x597   : > { %v4670_v55 = vpop.f32.mrb[16].mxu1 }
 0x598   : > { %v1905_v56 = vpop.f32.mrb[17].mxu1  ;;  %v1944_v58 = vsel %vm1934_vm5, %v4670_v55, -inf }
 0x599   : > { %1936 = vmax.xlane.f32.xlu0 %v1935_v57  ;;  %1945 = vmax.xlane.f32.xlu1 %v1944_v58  ;;  %v1941_v61 = vsel %vm1934_vm5, %v1905_v56, -inf }
 0x59b   : > { %v4673_v8 = vpop.f32.mrb[18].mxu1 }
 0x59c   : > { %v1915_v60 = vpop.f32.mrb[19].mxu1  ;;  %v1950_v10 = vsel %vm1934_vm5, %v4673_v8, -inf }
 0x59d   : > { %1942 = vmax.xlane.f32.xlu1 %v1941_v61  ;;  %v1947_v62 = vsel %vm1934_vm5, %v1915_v60, -inf }
 0x59e   : > { %1948 = vmax.xlane.f32.xlu0 %v1947_v62 }
 0x59f   : > { %v6198_v9 = vpop.f32.mrb[20].mxu1 }
 0x5a0   : > { %v6200_v63 = vpop.f32.mrb[21].mxu1  ;;  %v1956_v11 = vsel %vm1934_vm5, %v6198_v9, -inf }
 0x5a1   : > { %1951 = vmax.xlane.f32.xlu1 %v1950_v10  ;;  %v1953_v5 = vsel %vm1934_vm5, %v6200_v63, -inf }
 0x5a2   : > { %1957 = vmax.xlane.f32.xlu0 %v1956_v11 }
 0x5a6   : > { %1954 = vmax.xlane.f32.xlu0 %v1953_v5 }
 0x5b2   : > { %5267 = vrot.lane.b32.xlu1 %v6094_v7, %s5599_s15 }
 0x5b6   : > { %5272 = vrot.lane.b32.xlu1 %v6104_v44, %s5599_s15 }
 0x5ba   : > { %2153 = vrot.lane.b32.xlu1 %v6161_v4, %s5599_s15 }
 0x5bc   : > { %5262 = vrot.lane.b32.xlu0 %v6082_v25, %s5599_s15 }
 0x5be   : > { %2155 = vrot.lane.b32.xlu1 %v6163_v6, %s5599_s15 }
 0x5c0   : > { %2157 = vrot.lane.b32.xlu0 %v6169_v38, %s5599_s15 }
 0x5c2   : > { %2159 = vrot.lane.b32.xlu1 %v6171_v39, %s5599_s15 }
 0x5c4   : > { %2161 = vrot.lane.b32.xlu0 %v6177_v43, %s5599_s15 }
 0x5c6   : > { %2163 = vrot.lane.b32.xlu1 %v6179_v31, %s5599_s15 }
 0x5c8   : > { %2165 = vrot.lane.b32.xlu0 %v6185_v49, %s5599_s15 }
 0x5ca   : > { %2167 = vrot.lane.b32.xlu1 %v6187_v50, %s5599_s15 }
 0x5cc   : > { %5277 = vrot.lane.b32.xlu0 %v6060_v1, %s5600_s24 }
 0x5ce   : > { %5282 = vrot.lane.b32.xlu1 %v6082_v25, %s5600_s24 }
 0x5d0   : > { %5287 = vrot.lane.b32.xlu0 %v6094_v7, %s5600_s24 }
 0x5d2   : > { %5292 = vrot.lane.b32.xlu1 %v6104_v44, %s5600_s24 }
 0x5d4   : > { %2830 = vrot.lane.b32.xlu0 %v6161_v4, %s5600_s24 }
 0x5d6   : > { %2832 = vrot.lane.b32.xlu1 %v6163_v6, %s5600_s24 }
 0x5d8   : > { %2834 = vrot.lane.b32.xlu0 %v6169_v38, %s5600_s24 }
 0x5da   : > { %2836 = vrot.lane.b32.xlu1 %v6171_v39, %s5600_s24 }
 0x5dc   : > { %2838 = vrot.lane.b32.xlu0 %v6177_v43, %s5600_s24 }
 0x5de   : > { %2840 = vrot.lane.b32.xlu1 %v6179_v31, %s5600_s24 }
 0x5e0   : > { %2842 = vrot.lane.b32.xlu0 %v6185_v49, %s5600_s24 }
 0x5e2   : > { %2844 = vrot.lane.b32.xlu1 %v6187_v50, %s5600_s24 }
 0x5e6   : > { %5297 = vrot.lane.b32.xlu1 %v6068_v13, %s5599_s15 }
 0x622   : > { %v1940_v12 = vpop.xlane.xlu0 %1939 }
 0x623   : > { %v1960_v16 = vsub.f32 %v4667_v52, %v1940_v12 }
 0x625   : > { %v1969_v15 = vmul.f32 1.442695, %v1960_v16 }
 0x626   : > { %v1937_v21 = vpop.xlane.xlu0 %1936  ;;  %v1946_v28 = vpop.xlane.xlu1 %1945 }
 0x627   : > { %v1959_v35 = vsub.f32 %v1895_v53, %v1937_v21  ;;  %v1962_v14 = vsub.f32 %v4670_v55, %v1946_v28 }
 0x629   : > { %v1967_v36 = vmul.f32 1.442695, %v1959_v35  ;;  %v1973_v37 = vmul.f32 1.442695, %v1962_v14 }
 0x62a   : > { %v1943_v17 = vpop.xlane.xlu1 %1942 }
 0x62b   : > { %5380 = vpow2.f32 %v1967_v36  ;;  %v1961_v40 = vsub.f32 %v1905_v56, %v1943_v17  ;;  %v1949_v19 = vpop.xlane.xlu0 %1948 }
 0x62c   : > { %5382 = vpow2.f32 %v1969_v15  ;;  %v1963_v23 = vsub.f32 %v1915_v60, %v1949_v19 }
 0x62d   : > { %v1971_v45 = vmul.f32 1.442695, %v1961_v40  ;;  %5384 = vpow2.f32 %v1973_v37 }
 0x62e   : > { %v1975_v18 = vmul.f32 1.442695, %v1963_v23  ;;  %v1952_v20 = vpop.xlane.xlu1 %1951 }
 0x62f   : > { %5386 = vpow2.f32 %v1971_v45  ;;  %v1964_v51 = vsub.f32 %v4673_v8, %v1952_v20  ;;  %v1958_v24 = vpop.xlane.xlu0 %1957 }
 0x630   : > { %5388 = vpow2.f32 %v1975_v18  ;;  %v1966_v27 = vsub.f32 %v6198_v9, %v1958_v24 }
 0x631   : > { %v1977_v26 = vmul.f32 1.442695, %v1964_v51 }
 0x632   : > { %v5268_v59 = vpop.permute.xlu1 %5267  ;;  %v1981_v33 = vmul.f32 1.442695, %v1966_v27 }
 0x633   : > { %5390 = vpow2.f32 %v1977_v26  ;;  %v1955_v2 = vpop.xlane.xlu0 %1954  ;;  %v5270_v58 = vunpack.i.h.bf16 %v5268_v59  ;;  %v5269_v8 = vunpack.i.l.bf16 %v5268_v59 }
 0x634   : > { %v1965_v3 = vsub.f32 %v6200_v63, %v1955_v2 }
 0x635   : > { %v6257_v22 = vpop.eup %5380  ;;  %v5061_v62 = vpack.c.bf16 %v5270_v58, %v5269_v8 }
 0x636   : > { %v6259_v34 = vpop.eup %5382  ;;  %v1979_v41 = vmul.f32 1.442695, %v1965_v3  ;;  %4693 = vmatprep.mubr.msk.f32.mxu0 %vm1934_vm5, %v6257_v22  ;;  %v5273_v42 = vpop.permute.xlu1 %5272 }
 0x637   : > { %4694 = vmatmul.mubr.msk.f32.vlgmr.msra.gmra.mrb[26].mxu0 %vm1934_vm5, %v6259_v34  ;;  %v5263_v46 = vpop.permute.xlu0 %5262  ;;  %v6265_v48 = vpop.eup %5384  ;;  %v5275_v5 = vunpack.i.h.bf16 %v5273_v42  ;;  %v5274_v12 = vunpack.i.l.bf16 %v5273_v42 }
 0x638   : > { %5392 = vpow2.f32 %v1979_v41  ;;  %5054 = vmatpush3.bf16.xpose.msk.msra.mxu0 %vm5848_vm3, %v6152_v30  ;;  %v5265_v52 = vunpack.i.h.bf16 %v5263_v46  ;;  %v5264_v53 = vunpack.i.l.bf16 %v5263_v46 }
 0x639   : > { %v6270_v54 = vpop.eup %5386  ;;  %5394 = vpow2.f32 %v1981_v33  ;;  %v5067_v28 = vpack.c.bf16 %v5275_v5, %v5274_v12 }
 0x63a   : > { %v6272_v55 = vpop.eup %5388  ;;  %v5055_v56 = vpack.c.bf16 %v5265_v52, %v5264_v53  ;;  %4696 = vmatprep.mubr.msk.f32.mxu0 %vm1934_vm5, %v6270_v54  ;;  %v2154_v57 = vpop.permute.xlu1 %2153 }
 0x63b   : > { %4697 = vmatmul.mubr.msk.f32.gmra.mrb[28].mxu0 %vm1934_vm5, %v6265_v48  ;;  %v2158_v60 = vpop.permute.xlu0 %2157 }
 0x63c   : > { %4699 = vmatprep.mubr.msk.f32.mxu0 %vm1934_vm5, %v6272_v55  ;;  %5057 = vmatprep.subr.msk.bf16.mxu0 %vm5848_vm3, %v5055_v56 }
 0x63d   : > { %v6282_v30 = vpop.eup %5390 }
 0x63e   : > { %v2156_v61 = vpop.permute.xlu1 %2155 }
 0x63f   : > { %4700 = vmatmul.mubr.msk.f32.gmra.mrb[30].mxu0 %vm1934_vm5, %v6282_v30  ;;  %v2162_v9 = vpop.permute.xlu0 %2161 }
 0x640   : > { %5060 = vmatpush3.bf16.xpose.msk.msra.mxu0 %vm5848_vm3, %v5055_v56 }
 0x641   : > { %5063 = vmatprep.subr.msk.bf16.mxu0 %vm5848_vm3, %v5061_v62 }
 0x642   : > { %v6290_v63 = vpop.eup %5392  ;;  %v2160_v10 = vpop.permute.xlu1 %2159 }
 0x643   : > { %v6292_v11 = vpop.eup %5394  ;;  %4702 = vmatprep.mubr.msk.f32.mxu0 %vm1934_vm5, %v6290_v63  ;;  %v2166_v16 = vpop.permute.xlu0 %2165 }
 0x644   : > { %4703 = vmatmul.mubr.msk.f32.gmra.mrb[32].mxu0 %vm1934_vm5, %v6292_v11 }
 0x645   : > { %4721 = vmatprep.mubr.msk.f32.mxu0 %vm746_vm2, %v2154_v57 }
 0x646   : > { %v2164_v21 = vpop.permute.xlu1 %2163 }
 0x647   : > { %v5278_v35 = vpop.permute.xlu0 %5277 }
 0x648   : > { %5066 = vmatpush3.bf16.xpose.msk.msra.mxu0 %vm5848_vm3, %v5061_v62  ;;  %v5280_v15 = vunpack.i.h.bf16 %v5278_v35  ;;  %v5279_v36 = vunpack.i.l.bf16 %v5278_v35 }
 0x649   : > { %5069 = vmatprep.subr.msk.bf16.mxu0 %vm5848_vm3, %v5067_v28 }
 0x64a   : > { %v2168_v14 = vpop.permute.xlu1 %2167  ;;  %v5089_v17 = vpack.c.bf16 %v5280_v15, %v5279_v36 }
 0x64b   : > { %v5288_v20 = vpop.permute.xlu0 %5287 }
 0x64c   : > { %v5290_v24 = vunpack.i.h.bf16 %v5288_v20  ;;  %v5289_v26 = vunpack.i.l.bf16 %v5288_v20 }
 0x64e   : > { %v5283_v37 = vpop.permute.xlu1 %5282  ;;  %v5101_v59 = vpack.c.bf16 %v5290_v24, %v5289_v26 }
 0x64f   : > { %v5285_v19 = vunpack.i.h.bf16 %v5283_v37  ;;  %v5284_v23 = vunpack.i.l.bf16 %v5283_v37  ;;  %v2831_v3 = vpop.permute.xlu0 %2830 }
 0x650   : > { %5072 = vmatpush3.bf16.xpose.msk.msra.mxu0 %vm5848_vm3, %v5067_v28 }
 0x651   : > { %5091 = vmatprep.subr.msk.bf16.mxu0 %vm5848_vm3, %v5089_v17  ;;  %v5095_v18 = vpack.c.bf16 %v5285_v19, %v5284_v23 }
 0x652   : > { %v5293_v40 = vpop.permute.xlu1 %5292 }
 0x653   : > { %v5295_v33 = vunpack.i.h.bf16 %v5293_v40  ;;  %v5294_v41 = vunpack.i.l.bf16 %v5293_v40  ;;  %v2835_v57 = vpop.permute.xlu0 %2834 }
 0x655   : > { %v5107_v46 = vpack.c.bf16 %v5295_v33, %v5294_v41 }
 0x656   : > { %v2833_v45 = vpop.permute.xlu1 %2832 }
 0x657   : > { %4722 = vmatmul.mubr.msk.f32.vlgmr.msra.gmra.mrb[34].mxu0 %vm746_vm2, %v2156_v61  ;;  %v2839_v58 = vpop.permute.xlu0 %2838 }
 0x658   : > { %4724 = vmatprep.mubr.msk.f32.mxu0 %vm746_vm2, %v2158_v60  ;;  %5094 = vmatpush3.bf16.xpose.msk.msra.mxu0 %vm5848_vm3, %v5089_v17 }
 0x659   : > { %5097 = vmatprep.subr.msk.bf16.mxu0 %vm5848_vm3, %v5095_v18 }
 0x65a   : > { %v2837_v51 = vpop.permute.xlu1 %2836 }
 0x65b   : > { %4725 = vmatmul.mubr.msk.f32.gmra.mrb[36].mxu0 %vm746_vm2, %v2160_v10  ;;  %v2843_v8 = vpop.permute.xlu0 %2842 }
 0x65c   : > { %4727 = vmatprep.mubr.msk.f32.mxu0 %vm746_vm2, %v2162_v9 }
 0x65e   : > { %v2841_v27 = vpop.permute.xlu1 %2840 }
 0x65f   : > { %4728 = vmatmul.mubr.msk.f32.gmra.mrb[38].mxu0 %vm746_vm2, %v2164_v21 }
 0x660   : > { %4730 = vmatprep.mubr.msk.f32.mxu0 %vm746_vm2, %v2166_v16  ;;  %5100 = vmatpush3.bf16.xpose.msk.msra.mxu0 %vm5848_vm3, %v5095_v18 }
 0x661   : > { %5103 = vmatprep.subr.msk.bf16.mxu0 %vm5848_vm3, %v5101_v59 }
 0x662   : > { %v2845_v2 = vpop.permute.xlu1 %2844 }
 0x663   : > { %4731 = vmatmul.mubr.msk.f32.gmra.mrb[40].mxu0 %vm746_vm2, %v2168_v14 }
 0x664   : > { %4805 = vmatprep.mubr.msk.f32.mxu0 %vm746_vm2, %v2831_v3 }
 0x666   : > { %v5298_v42 = vpop.permute.xlu1 %5297 }
 0x667   : > { %v5300_v52 = vunpack.i.h.bf16 %v5298_v42  ;;  %v5299_v53 = vunpack.i.l.bf16 %v5298_v42 }
 0x668   : > { %5106 = vmatpush3.bf16.xpose.msk.msra.mxu0 %vm5848_vm3, %v5101_v59 }
 0x669   : > { %v5073_v56 = vpack.c.bf16 %v5300_v52, %v5299_v53  ;;  %5109 = vmatprep.subr.msk.bf16.mxu0 %vm5848_vm3, %v5107_v46 }
 0x66b   : > { %5074 = vmatprep.subr.bf16.mxu1 %v5073_v56 }
 0x66c   : > { %5076 = vmatpush3.bf16.msra.mxu1 %v5073_v56 }
 0x670   : > { %5112 = vmatpush3.bf16.xpose.msk.msra.mxu0 %vm5848_vm3, %v5107_v46 }
 0x677   : > { %4806 = vmatmul.mubr.msk.f32.vlgmr.msra.gmra.mrb[42].mxu0 %vm746_vm2, %v2833_v45 }
 0x678   : > { %4808 = vmatprep.mubr.msk.f32.mxu0 %vm746_vm2, %v2835_v57 }
 0x67b   : > { %4809 = vmatmul.mubr.msk.f32.gmra.mrb[44].mxu0 %vm746_vm2, %v2837_v51 }
 0x67c   : > { %4811 = vmatprep.mubr.msk.f32.mxu0 %vm746_vm2, %v2839_v58 }
 0x67f   : > { %4812 = vmatmul.mubr.msk.f32.gmra.mrb[46].mxu0 %vm746_vm2, %v2841_v27 }
 0x680   : > { %4814 = vmatprep.mubr.msk.f32.mxu0 %vm746_vm2, %v2843_v8 }
 0x683   : > { %4815 = vmatmul.mubr.msk.f32.gmra.mrb[48].mxu0 %vm746_vm2, %v2845_v2 }
 0x70a   : > { %v6336_v60 = vpop.f32.mrb[26].mxu0 }
 0x70b   : > { %v6338_v61 = vpop.f32.mrb[27].mxu0 }
 0x70e   : > { %v6340_v62 = vpop.f32.mrb[28].mxu0 }
 0x70f   : > { %v6342_v9 = vpop.f32.mrb[29].mxu0 }
 0x712   : > { %v6344_v10 = vpop.f32.mrb[30].mxu0 }
 0x713   : > { %v6346_v5 = vpop.f32.mrb[31].mxu0 }
 0x717   : > { %v6348_v12 = vpop.f32.mrb[32].mxu0 }
 0x718   : > { %v6350_v16 = vpop.f32.mrb[33].mxu0 }
 0x72a   : > { %v6352_v21 = vpop.f32.mrb[34].mxu0 }
 0x72b   : > { %v6354_v28 = vpop.f32.mrb[35].mxu0  ;;  %v2325_v35 = vsel %vm1934_vm5, %v6352_v21, -inf }
 0x72c   : > { %2326 = vmax.xlane.f32.xlu1 %v2325_v35  ;;  %v2322_v14 = vsel %vm1934_vm5, %v6354_v28, -inf }
 0x72d   : > { %2323 = vmax.xlane.f32.xlu0 %v2322_v14 }
 0x72e   : > { %v6360_v15 = vpop.f32.mrb[36].mxu0 }
 0x72f   : > { %v6362_v36 = vpop.f32.mrb[37].mxu0  ;;  %v2331_v37 = vsel %vm1934_vm5, %v6360_v15, -inf }
 0x730   : > { %v2328_v23 = vsel %vm1934_vm5, %v6362_v36, -inf }
 0x731   : > { %2332 = vmax.xlane.f32.xlu0 %v2331_v37 }
 0x732   : > { %v6366_v17 = vpop.f32.mrb[38].mxu0 }
 0x733   : > { %v6368_v40 = vpop.f32.mrb[39].mxu0  ;;  %v2337_v19 = vsel %vm1934_vm5, %v6366_v17, -inf }
 0x734   : > { %2338 = vmax.xlane.f32.xlu1 %v2337_v19  ;;  %v2334_v20 = vsel %vm1934_vm5, %v6368_v40, -inf }
 0x735   : > { %2329 = vmax.xlane.f32.xlu0 %v2328_v23 }
 0x736   : > { %v6374_v45 = vpop.f32.mrb[40].mxu0 }
 0x737   : > { %v6376_v18 = vpop.f32.mrb[41].mxu0  ;;  %v2343_v51 = vsel %vm1934_vm5, %v6374_v45, -inf }
 0x738   : > { %v2340_v24 = vsel %vm1934_vm5, %v6376_v18, -inf }
 0x739   : > { %2335 = vmax.xlane.f32.xlu0 %v2334_v20 }
 0x73d   : > { %2344 = vmax.xlane.f32.xlu0 %v2343_v51 }
 0x741   : > { %2341 = vmax.xlane.f32.xlu0 %v2340_v24 }
 0x745   : > { %5307 = vrot.lane.b32.xlu1 %v6098_v32, %s5599_s15 }
 0x749   : > { %5312 = vrot.lane.b32.xlu1 %v6108_v47, %s5599_s15 }
 0x74a   : > { %v6388_v26 = vpop.f32.mrb[42].mxu0 }
 0x74b   : > { %v6390_v27 = vpop.f32.mrb[43].mxu0 }
 0x74d   : > { %5317 = vrot.lane.b32.xlu1 %v6060_v1, %s5601_s18  ;;  %v1986_v1 = vsel %vm1934_vm5, %v6259_v34, 0.0 }
 0x74e   : > { %v6394_v59 = vpop.f32.mrb[44].mxu0 }
 0x74f   : > { %v6396_v2 = vpop.f32.mrb[45].mxu0 }
 0x751   : > { %5322 = vrot.lane.b32.xlu1 %v6082_v25, %s5601_s18  ;;  %v1983_v25 = vsel %vm1934_vm5, %v6257_v22, 0.0 }
 0x752   : > { %v6400_v3 = vpop.f32.mrb[46].mxu0 }
 0x753   : > { %v6402_v33 = vpop.f32.mrb[47].mxu0  ;;  %v3014_v22 = vsel %vm1934_vm5, %v6400_v3, -inf }
 0x754   : > { %v3011_v34 = vsel %vm1934_vm5, %v6402_v33, -inf }
 0x755   : > { %5332 = vrot.lane.b32.xlu1 %v6104_v44, %s5601_s18  ;;  %v1989_v44 = vsel %vm1934_vm5, %v6270_v54, 0.0 }
 0x756   : > { %v6406_v41 = vpop.f32.mrb[48].mxu0 }
 0x757   : > { %v6408_v42 = vpop.f32.mrb[49].mxu0  ;;  %5302 = vrot.lane.b32.xlu0 %v6086_v29, %s5599_s15  ;;  %s514_s15 = sand.u32 1, %s5578_s19  }
 0x758   : > { %s4065_s29 = sshll.u32 %s514_s15, 6  ;;  %s6782_s21 = scalar_lea.sflag [#allocation7], %s514_s15 }
 0x759   : > { %3380 = vrot.lane.b32.xlu1 %v6163_v6, %s5601_s18  ;;  %v1995_v6 = vsel %vm1934_vm5, %v6272_v55, 0.0  ;;  %s6747_s27 = scalar_lea.vmem [#allocation6], %s4065_s29 }
 0x75b   : > { %5327 = vrot.lane.b32.xlu0 %v6094_v7, %s5601_s18  ;;  %v1992_v7 = vsel %vm1934_vm5, %v6265_v48, 0.0  ;;  %v3017_v48 = vsel %vm1934_vm5, %v6408_v42, -inf }
 0x75d   : > { %3384 = vrot.lane.b32.xlu1 %v6171_v39, %s5601_s18  ;;  %v2001_v39 = vsel %vm1934_vm5, %v6290_v63, 0.0 }
 0x75f   : > { %3378 = vrot.lane.b32.xlu0 %v6161_v4, %s5601_s18  ;;  %v1998_v4 = vsel %vm1934_vm5, %v6282_v30, 0.0 }
 0x761   : > { %3388 = vrot.lane.b32.xlu1 %v6179_v31, %s5601_s18  ;;  %v2999_v31 = vsel %vm1934_vm5, %v6390_v27, -inf }
 0x763   : > { %3382 = vrot.lane.b32.xlu0 %v6169_v38, %s5601_s18  ;;  %v2004_v38 = vsel %vm1934_vm5, %v6292_v11, 0.0 }
 0x765   : > { %3392 = vrot.lane.b32.xlu1 %v6187_v50, %s5601_s18  ;;  %v3005_v50 = vsel %vm1934_vm5, %v6396_v2, -inf }
 0x767   : > { %3386 = vrot.lane.b32.xlu0 %v6177_v43, %s5601_s18  ;;  %v3002_v43 = vsel %vm1934_vm5, %v6388_v26, -inf }
 0x76b   : > { %3390 = vrot.lane.b32.xlu0 %v6185_v49, %s5601_s18  ;;  %v3008_v49 = vsel %vm1934_vm5, %v6394_v59, -inf }
 0x789   : > { %1987 = vadd.xlane.f32.xlu1 %v1986_v1 }
 0x78a   : > { %1984 = vadd.xlane.f32.xlu0 %v1983_v25 }
 0x78d   : > { %1993 = vadd.xlane.f32.xlu1 %v1992_v7 }
 0x78e   : > { %1990 = vadd.xlane.f32.xlu0 %v1989_v44 }
 0x791   : > { %1999 = vadd.xlane.f32.xlu1 %v1998_v4 }
 0x792   : > { %1996 = vadd.xlane.f32.xlu0 %v1995_v6 }
 0x795   : > { %2005 = vadd.xlane.f32.xlu1 %v2004_v38 }
 0x796   : > { %2002 = vadd.xlane.f32.xlu0 %v2001_v39 }
 0x799   : > { %3003 = vmax.xlane.f32.xlu1 %v3002_v43 }
 0x79a   : > { %3000 = vmax.xlane.f32.xlu0 %v2999_v31 }
 0x79d   : > { %3009 = vmax.xlane.f32.xlu1 %v3008_v49 }
 0x79e   : > { %3006 = vmax.xlane.f32.xlu0 %v3005_v50 }
 0x7a1   : > { %3015 = vmax.xlane.f32.xlu1 %v3014_v22 }
 0x7a2   : > { %3012 = vmax.xlane.f32.xlu0 %v3011_v34 }
 0x7a6   : > { %3018 = vmax.xlane.f32.xlu0 %v3017_v48 }
 0x7b9   : > { %v2327_v54 = vpop.xlane.xlu1 %2326 }
 0x7ba   : > { %v2347_v55 = vsub.f32 %v6352_v21, %v2327_v54  ;;  %v2324_v30 = vpop.xlane.xlu0 %2323 }
 0x7bb   : > { %v2346_v63 = vsub.f32 %v6354_v28, %v2324_v30 }
 0x7bc   : > { %v2356_v11 = vmul.f32 1.442695, %v2347_v55 }
 0x7bd   : > { %v2354_v46 = vmul.f32 1.442695, %v2346_v63 }
 0x7be   : > { %5396 = vpow2.f32 %v2356_v11  ;;  %v2333_v52 = vpop.xlane.xlu0 %2332 }
 0x7bf   : > { %5398 = vpow2.f32 %v2354_v46  ;;  %v2349_v53 = vsub.f32 %v6360_v15, %v2333_v52 }
 0x7c1   : > { %v2360_v56 = vmul.f32 1.442695, %v2349_v53  ;;  %v2339_v57 = vpop.xlane.xlu1 %2338 }
 0x7c2   : > { %v2351_v58 = vsub.f32 %v6366_v17, %v2339_v57  ;;  %v2330_v8 = vpop.xlane.xlu0 %2329 }
 0x7c3   : > { %5400 = vpow2.f32 %v2360_v56  ;;  %v2348_v35 = vsub.f32 %v6362_v36, %v2330_v8 }
 0x7c4   : > { %v2364_v14 = vmul.f32 1.442695, %v2351_v58 }
 0x7c5   : > { %v2358_v21 = vmul.f32 1.442695, %v2348_v35  ;;  %v5308_v37 = vpop.permute.xlu1 %5307 }
 0x7c6   : > { %v2336_v19 = vpop.xlane.xlu0 %2335  ;;  %v5310_v50 = vunpack.i.h.bf16 %v5308_v37  ;;  %v5309_v30 = vunpack.i.l.bf16 %v5308_v37 }
 0x7c7   : > { %5402 = vpow2.f32 %v2358_v21  ;;  %v2350_v28 = vsub.f32 %v6368_v40, %v2336_v19 }
 0x7c8   : > { %v6466_v23 = vpop.eup %5396  ;;  %5404 = vpow2.f32 %v2364_v14  ;;  %v5081_v56 = vpack.c.bf16 %v5310_v50, %v5309_v30 }
 0x7c9   : > { %v5399_v20 = vpop.eup %5398  ;;  %v5313_v15 = vpop.permute.xlu1 %5312  ;;  %v2373_v51 = vsel %vm1934_vm5, %v6466_v23, 0.0  ;;  %v2362_v17 = vmul.f32 1.442695, %v2350_v28 }
 0x7ca   : > { %4749 = vmatprep.mubr.msk.f32.mxu1 %vm1934_vm5, %v5399_v20  ;;  %v2345_v24 = vpop.xlane.xlu0 %2344  ;;  %2374 = vadd.xlane.f32.xlu1 %v2373_v51  ;;  %v2370_v36 = vsel %vm1934_vm5, %v5399_v20, 0.0  ;;  %v5315_v35 = vunpack.i.h.bf16 %v5313_v15  ;;  %v5314_v14 = vunpack.i.l.bf16 %v5313_v15 }
 0x7cb   : > { %v2353_v1 = vsub.f32 %v6374_v45, %v2345_v24  ;;  %2371 = vadd.xlane.f32.xlu0 %v2370_v36  ;;  %5406 = vpow2.f32 %v2362_v17 }
 0x7cc   : > { %v5085_v51 = vpack.c.bf16 %v5315_v35, %v5314_v14 }
 0x7cd   : > { %v6473_v25 = vpop.eup %5400  ;;  %v2368_v40 = vmul.f32 1.442695, %v2353_v1  ;;  %v5318_v7 = vpop.permute.xlu1 %5317 }
 0x7ce   : > { %v5320_v44 = vunpack.i.h.bf16 %v5318_v7  ;;  %v5319_v4 = vunpack.i.l.bf16 %v5318_v7  ;;  %v2342_v6 = vpop.xlane.xlu0 %2341  ;;  %v2379_v38 = vsel %vm1934_vm5, %v6473_v25, 0.0  ;;  %v3020_v7 = vsel %vm1934_vm5, %v6406_v41, -inf }
 0x7cf   : > { %5408 = vpow2.f32 %v2368_v40  ;;  %v2352_v39 = vsub.f32 %v6376_v18, %v2342_v6  ;;  %2380 = vadd.xlane.f32.xlu1 %v2379_v38  ;;  %v2571_v6 = vld [vmem:[%s6840_s12 + $0x8] sm:$0xff] }
 0x7d0   : > { %v5129_v43 = vpack.c.bf16 %v5320_v44, %v5319_v4 }
 0x7d1   : > { %v5403_v31 = vpop.eup %5402  ;;  %v2366_v49 = vmul.f32 1.442695, %v2352_v39  ;;  %v5323_v45 = vpop.permute.xlu1 %5322 }
 0x7d2   : > { %v5325_v22 = vunpack.i.h.bf16 %v5323_v45  ;;  %v5324_v34 = vunpack.i.l.bf16 %v5323_v45  ;;  %5131 = vmatprep.subr.msk.bf16.mxu0 %vm5848_vm3, %v5129_v43  ;;  %v5303_v48 = vpop.permute.xlu0 %5302  ;;  %v2376_v54 = vsel %vm1934_vm5, %v5403_v31, 0.0  ;;  %v5405_v55 = vpop.eup %5404 }
 0x7d3   : > { %5410 = vpow2.f32 %v2366_v49  ;;  %v5305_v63 = vunpack.i.h.bf16 %v5303_v48  ;;  %v5304_v11 = vunpack.i.l.bf16 %v5303_v48  ;;  %5134 = vmatpush3.bf16.xpose.msk.msra.mxu0 %vm5848_vm3, %v5129_v43  ;;  %2377 = vadd.xlane.f32.xlu0 %v2376_v54  ;;  %v2385_v53 = vsel %vm1934_vm5, %v5405_v55, 0.0  ;;  %v2152_v43 = vld [vmem:[%s6840_s12] sm:$0xff] }
 0x7d4   : > { %v5135_v18 = vpack.c.bf16 %v5325_v22, %v5324_v34 }
 0x7d5   : > { %v5077_v46 = vpack.c.bf16 %v5305_v63, %v5304_v11  ;;  %v5407_v8 = vpop.eup %5406  ;;  %v5333_v17 = vpop.permute.xlu1 %5332 }
 0x7d6   : > { %5137 = vmatprep.subr.msk.bf16.mxu0 %vm5848_vm3, %v5135_v18  ;;  %v5328_v52 = vpop.permute.xlu0 %5327  ;;  %v2382_v20 = vsel %vm1934_vm5, %v5407_v8, 0.0  ;;  %v5335_v36 = vunpack.i.h.bf16 %v5333_v17  ;;  %v5334_v1 = vunpack.i.l.bf16 %v5333_v17 }
 0x7d7   : > { %v5330_v57 = vunpack.i.h.bf16 %v5328_v52  ;;  %v5329_v58 = vunpack.i.l.bf16 %v5328_v52  ;;  %2386 = vadd.xlane.f32.xlu0 %v2385_v53  ;;  %5078 = vmatprep.subr.bf16.mxu1 %v5077_v46 }
 0x7d8   : > { %5080 = vmatpush3.bf16.msra.mxu1 %v5077_v46  ;;  %v5147_v40 = vpack.c.bf16 %v5335_v36, %v5334_v1 }
 0x7d9   : > { %v5409_v21 = vpop.eup %5408  ;;  %v5141_v37 = vpack.c.bf16 %v5330_v57, %v5329_v58  ;;  %5082 = vmatprep.subr.bf16.mxu1 %v5081_v56  ;;  %v3381_v44 = vpop.permute.xlu1 %3380 }
 0x7da   : > { %v3379_v19 = vpop.permute.xlu0 %3378  ;;  %v2391_v28 = vsel %vm1934_vm5, %v5409_v21, 0.0 }
 0x7db   : > { %5140 = vmatpush3.bf16.xpose.msk.msra.mxu0 %vm5848_vm3, %v5135_v18  ;;  %2392 = vadd.xlane.f32.xlu1 %v2391_v28 }
 0x7dc   : > { %2383 = vadd.xlane.f32.xlu0 %v2382_v20  ;;  %4875 = vmatprep.mubr.msk.f32.mxu0 %vm746_vm2, %v3379_v19 }
 0x7dd   : > { %v5411_v24 = vpop.eup %5410  ;;  %5084 = vmatpush3.bf16.msra.mxu1 %v5081_v56  ;;  %5143 = vmatprep.subr.msk.bf16.mxu0 %vm5848_vm3, %v5141_v37 }
 0x7de   : > { %5086 = vmatprep.subr.bf16.mxu1 %v5085_v51  ;;  %v2388_v15 = vsel %vm1934_vm5, %v5411_v24, 0.0 }
 0x7e0   : > { %2389 = vadd.xlane.f32.xlu0 %v2388_v15 }
 0x7e1   : > { %5088 = vmatpush3.bf16.msra.mxu1 %v5085_v51 }
 0x7e2   : > { %4761 = vmatprep.subr.mxu1 %v2571_v6 }
 0x7e3   : > { %5146 = vmatpush3.bf16.xpose.msk.msra.mxu0 %vm5848_vm3, %v5141_v37 }
 0x7e4   : > { %3021 = vmax.xlane.f32.xlu0 %v3020_v7  ;;  %4750 = vmatmul.mubr.msk.f32.vlgmr.msra.gmra.mrb[22].mxu1 %vm1934_vm5, %v6466_v23  ;;  %v3383_v23 = vpop.permute.xlu0 %3382 }
 0x7e5   : > { %4752 = vmatprep.mubr.msk.f32.mxu1 %vm1934_vm5, %v5403_v31  ;;  %5149 = vmatprep.subr.msk.bf16.mxu0 %vm5848_vm3, %v5147_v40 }
 0x7e6   : > { %4762 = vmatpush3.msra.mxu1 %v2571_v6 }
 0x7e7   : > { %4775 = vmatprep.subr.mxu1 %v2152_v43 }
 0x7e8   : > { %4753 = vmatmul.mubr.msk.f32.gmra.mrb[24].mxu1 %vm1934_vm5, %v6473_v25  ;;  %v3385_v25 = vpop.permute.xlu1 %3384  ;;  %v3387_v0 = vpop.permute.xlu0 %3386 }
 0x7e9   : > { %4755 = vmatprep.mubr.msk.f32.mxu1 %vm1934_vm5, %v5407_v8 }
 0x7eb   : > { %5152 = vmatpush3.bf16.xpose.msk.msra.mxu0 %vm5848_vm3, %v5147_v40 }
 0x7ec   : > { %4756 = vmatmul.mubr.msk.f32.gmra.mrb[26].mxu1 %vm1934_vm5, %v5405_v55  ;;  %5337 = vrot.lane.b32.xlu1 %v6068_v13, %s5600_s24  ;;  %v3389_v4 = vpop.permute.xlu1 %3388  ;;  %v3391_v38 = vpop.permute.xlu0 %3390 }
 0x7ed   : > { %4758 = vmatprep.mubr.msk.f32.mxu1 %vm1934_vm5, %v5411_v24 }
 0x7f0   : > { %4759 = vmatmul.mubr.msk.f32.gmra.mrb[28].mxu1 %vm1934_vm5, %v5409_v21  ;;  %5347 = vrot.lane.b32.xlu1 %v6098_v32, %s5600_s24  ;;  %v3393_v39 = vpop.permute.xlu1 %3392 }
 0x7f2   : > { %4876 = vmatmul.mubr.msk.f32.vlgmr.msra.gmra.mrb[50].mxu0 %vm746_vm2, %v3381_v44 }
 0x7f3   : > { %4878 = vmatprep.mubr.msk.f32.mxu0 %vm746_vm2, %v3383_v23 }
 0x7f4   : > { %5352 = vrot.lane.b32.xlu1 %v6108_v47, %s5600_s24 }
 0x7f6   : > { %4879 = vmatmul.mubr.msk.f32.gmra.mrb[52].mxu0 %vm746_vm2, %v3385_v25 }
 0x7f7   : > { %4881 = vmatprep.mubr.msk.f32.mxu0 %vm746_vm2, %v3387_v0 }
 0x7fa   : > { %5342 = vrot.lane.b32.xlu0 %v6086_v29, %s5600_s24  ;;  %4882 = vmatmul.mubr.msk.f32.gmra.mrb[54].mxu0 %vm746_vm2, %v3389_v4  ;;  %s3973_s24 = sshll.u32 %s6747_s27, 4  ;;  %s6774_s24 = int_to_ptr.vmem [resolvable:$true] %s3973_s24 }
 0x7fb   : > { %4884 = vmatprep.mubr.msk.f32.mxu0 %vm746_vm2, %v3391_v38 }
 0x7fe   : > { %4885 = vmatmul.mubr.msk.f32.gmra.mrb[56].mxu0 %vm746_vm2, %v3393_v39 }
 0x816   : > { %v1988_v45 = vpop.xlane.xlu1 %1987 }
 0x817   : > { %v1985_v31 = vpop.xlane.xlu0 %1984 }
 0x81a   : > { %v1994_v22 = vpop.xlane.xlu1 %1993 }
 0x81b   : > { %v1991_v49 = vpop.xlane.xlu0 %1990 }
 0x81e   : > { %v6534_v48 = vpop.xlane.xlu1 %1999 }
 0x81f   : > { %v1997_v50 = vpop.xlane.xlu0 %1996 }
 0x822   : > { %v6538_v55 = vpop.xlane.xlu1 %2005 }
 0x823   : > { %v6532_v34 = vpop.xlane.xlu0 %2002 }
 0x826   : > { %v6542_v63 = vpop.xlane.xlu1 %3003 }
 0x827   : > { %v6536_v54 = vpop.xlane.xlu0 %3000 }
 0x82a   : > { %v6546_v18 = vpop.xlane.xlu1 %3009 }
 0x82b   : > { %v6540_v30 = vpop.xlane.xlu0 %3006 }
 0x82e   : > { %v6550_v52 = vpop.xlane.xlu1 %3015 }
 0x82f   : > { %v6544_v11 = vpop.xlane.xlu0 %3012 }
 0x833   : > { %v6548_v46 = vpop.xlane.xlu0 %3018 }
 0x857   : > { %v2375_v56 = vpop.xlane.xlu1 %2374 }
 0x858   : > { %v2372_v53 = vpop.xlane.xlu0 %2371 }
 0x859   : > { %5412 = vrcp.f32 %v2372_v53 }
 0x85a   : > { %5414 = vrcp.f32 %v2375_v56 }
 0x85c   : > { %v2381_v58 = vpop.xlane.xlu1 %2380 }
 0x860   : > { %v2378_v57 = vpop.xlane.xlu0 %2377 }
 0x861   : > { %5416 = vrcp.f32 %v2378_v57 }
 0x862   : > { %5418 = vrcp.f32 %v2381_v58 }
 0x863   : > { %v5413_v28 = vpop.eup %5412 }
 0x864   : > { %v2387_v8 = vpop.xlane.xlu0 %2386  ;;  %v5415_v24 = vpop.eup %5414 }
 0x868   : > { %v2393_v35 = vpop.xlane.xlu1 %2392 }
 0x869   : > { %v2384_v14 = vpop.xlane.xlu0 %2383 }
 0x86a   : > { %5420 = vrcp.f32 %v2384_v14 }
 0x86b   : > { %5422 = vrcp.f32 %v2387_v8  ;;  %v5417_v40 = vpop.eup %5416 }
 0x86c   : > { %v5338_v21 = vpop.permute.xlu1 %5337  ;;  %5424 = vrcp.f32 %v1985_v31  ;;  %v5419_v23 = vpop.eup %5418 }
 0x86d   : > { %v2390_v37 = vpop.xlane.xlu0 %2389  ;;  %v5340_v20 = vunpack.i.h.bf16 %v5338_v21  ;;  %v5339_v51 = vunpack.i.l.bf16 %v5338_v21 }
 0x86e   : > { %5426 = vrcp.f32 %v2390_v37 }
 0x86f   : > { %5428 = vrcp.f32 %v2393_v35  ;;  %v6553_v7 = vpack.c.bf16 %v5340_v20, %v5339_v51 }
 0x870   : > { %5430 = vrcp.f32 %v1988_v45 }
 0x871   : > { %5432 = vrcp.f32 %v1991_v49  ;;  %v6557_v4 = vpop.xlane.xlu0 %3021 }
 0x872   : > { %5434 = vrcp.f32 %v1994_v22  ;;  %v3024_v22 = vsub.f32 %v6388_v26, %v6542_v63 }
 0x873   : > { %5436 = vrcp.f32 %v1997_v50  ;;  %v3023_v50 = vsub.f32 %v6390_v27, %v6536_v54 }
 0x874   : > { %v5421_v38 = vpop.eup %5420  ;;  %5438 = vrcp.f32 %v6534_v48  ;;  %v5348_v48 = vpop.permute.xlu1 %5347  ;;  %v3033_v27 = vmul.f32 1.442695, %v3024_v22 }
 0x875   : > { %v5423_v31 = vpop.eup %5422  ;;  %v5343_v8 = vpop.permute.xlu0 %5342  ;;  %5440 = vrcp.f32 %v6532_v34 }
 0x876   : > { %v5425_v56 = vpop.eup %5424  ;;  %v5345_v20 = vunpack.i.h.bf16 %v5343_v8  ;;  %v5344_v51 = vunpack.i.l.bf16 %v5343_v8  ;;  %5442 = vrcp.f32 %v6538_v55 }
 0x877   : > { %v2144_v63 = vmul.f32 %v5425_v56, %v6338_v61  ;;  %v3025_v61 = vsub.f32 %v6396_v2, %v6540_v30  ;;  %5444 = vpow2.f32 %v3033_v27 }
 0x878   : > { %v5427_v49 = vpop.eup %5426  ;;  %v5353_v2 = vpop.permute.xlu1 %5352 }
 0x879   : > { %v5429_v58 = vpop.eup %5428  ;;  %v5354_v56 = vunpack.i.l.bf16 %v5353_v2 }
 0x8b7   : > { %v4751_v19 = vpop.f32.mrb[22].mxu1 }
 0x8b8   : > { %v2516_v17 = vpop.f32.mrb[23].mxu1  ;;  %v2564_v36 = vmul.f32 %v5415_v24, %v4751_v19 }
 0x8b9   : > { %v2563_v15 = vmul.f32 %v5413_v28, %v2516_v17  ;;  %v5431_v28 = vpop.eup %5430 }
 0x8ba   : > { %v5433_v34 = vpop.eup %5432  ;;  %v2145_v24 = vmul.f32 %v5431_v28, %v6336_v60  ;;  %v3026_v60 = vsub.f32 %v6394_v59, %v6546_v18 }
 0x8bb   : > { %v4754_v1 = vpop.f32.mrb[24].mxu1  ;;  %4763 = vmatprep.mubr.msk.f32.mxu1 %vm746_vm2, %v2563_v15  ;;  %v5435_v17 = vpop.eup %5434  ;;  %v3031_v15 = vmul.f32 1.442695, %v3023_v50 }
 0x8bc   : > { %v2526_v44 = vpop.f32.mrb[25].mxu1  ;;  %4764 = vmatmul.mubr.msk.f32.vlgmr.msra.gmra.mrb[30].mxu1 %vm746_vm2, %v2564_v36  ;;  %v2566_v0 = vmul.f32 %v5419_v23, %v4754_v1  ;;  %v5350_v23 = vunpack.i.h.bf16 %v5348_v48 }
 0x8bd   : > { %v2565_v25 = vmul.f32 %v5417_v40, %v2526_v44  ;;  %4776 = vmatpush3.msra.mxu1 %v2152_v43  ;;  %v2146_v40 = vmul.f32 %v5433_v34, %v6342_v9  ;;  %v5437_v44 = vpop.eup %5436  ;;  %v2147_v9 = vmul.f32 %v5435_v17, %v6340_v62  ;;  %5446 = vpow2.f32 %v3031_v15 }
 0x8be   : > { %5114 = vmatprep.subr.bf16.mxu1 %v6553_v7  ;;  %v5439_v18 = vpop.eup %5438 }
 0x8bf   : > { %v4757_v6 = vpop.f32.mrb[26].mxu1  ;;  %4766 = vmatprep.mubr.msk.f32.mxu1 %vm746_vm2, %v2565_v25  ;;  %v5349_v25 = vunpack.i.l.bf16 %v5348_v48 }
 0x8c0   : > { %v2536_v39 = vpop.f32.mrb[27].mxu1  ;;  %4767 = vmatmul.mubr.msk.f32.gmra.mrb[32].mxu1 %vm746_vm2, %v2566_v0  ;;  %v2568_v45 = vmul.f32 %v5423_v31, %v4757_v6  ;;  %v5117_v0 = vpack.c.bf16 %v5345_v20, %v5344_v51  ;;  %v3035_v6 = vmul.f32 1.442695, %v3025_v61  ;;  %v2148_v31 = vmul.f32 %v5437_v44, %v6346_v5  ;;  %v3240_v20 = vld [vmem:[%s6840_s12 + $0x10] sm:$0xff] }
 0x8c1   : > { %v2567_v53 = vmul.f32 %v5421_v38, %v2536_v39  ;;  %v3027_v38 = vsub.f32 %v6402_v33, %v6544_v11  ;;  %v5121_v62 = vpack.c.bf16 %v5350_v23, %v5349_v25  ;;  %v3037_v33 = vmul.f32 1.442695, %v3026_v60 }
 0x8c2   : > { %v3028_v11 = vsub.f32 %v6400_v3, %v6550_v52  ;;  %5448 = vpow2.f32 %v3035_v6  ;;  %v3029_v5 = vsub.f32 %v6408_v42, %v6548_v46  ;;  %v3030_v42 = vsub.f32 %v6406_v41, %v6557_v4 }
 0x8c3   : > { %v4760_v43 = vpop.f32.mrb[28].mxu1  ;;  %4769 = vmatprep.mubr.msk.f32.mxu1 %vm746_vm2, %v2567_v53  ;;  %v5441_v53 = vpop.eup %5440  ;;  %5450 = vpow2.f32 %v3037_v33 }
 0x8c4   : > { %v2546_v57 = vpop.f32.mrb[29].mxu1  ;;  %4770 = vmatmul.mubr.msk.f32.gmra.mrb[34].mxu1 %vm746_vm2, %v2568_v45  ;;  %v2570_v21 = vmul.f32 %v5429_v58, %v4760_v43  ;;  %v5355_v45 = vunpack.i.h.bf16 %v5353_v2  ;;  %v2149_v58 = vmul.f32 %v5439_v18, %v6344_v10  ;;  %v5443_v22 = vpop.eup %5442  ;;  %v2150_v3 = vmul.f32 %v5441_v53, %v6350_v16 }
 0x8c5   : > { %v2569_v35 = vmul.f32 %v5427_v49, %v2546_v57  ;;  %v6566_v14 = vpop.f32.mrb[50].mxu0  ;;  %v3039_v49 = vmul.f32 1.442695, %v3027_v38  ;;  %v3043_v10 = vmul.f32 1.442695, %v3029_v5  ;;  %v2151_v46 = vmul.f32 %v5443_v22, %v6348_v12  ;;  %v5445_v50 = vpop.eup %5444 }
 0x8c6   : > { %v6571_v37 = vpop.f32.mrb[51].mxu0  ;;  %v3550_v19 = vsel %vm1934_vm5, %v6566_v14, -inf  ;;  %v5125_v52 = vpack.c.bf16 %v5355_v45, %v5354_v56  ;;  %v3050_v41 = vsel %vm1934_vm5, %v5445_v50, 0.0 }
 0x8c7   : > { %4772 = vmatprep.mubr.msk.f32.mxu1 %vm746_vm2, %v2569_v35  ;;  %3551 = vmax.xlane.f32.xlu1 %v3550_v19  ;;  %v3547_v26 = vsel %vm1934_vm5, %v6571_v37, -inf  ;;  %v3041_v35 = vmul.f32 1.442695, %v3028_v11  ;;  %5452 = vpow2.f32 %v3039_v49  ;;  %v3045_v19 = vmul.f32 1.442695, %v3030_v42 }
 0x8c8   : > { %4773 = vmatmul.mubr.msk.f32.gmra.mrb[36].mxu1 %vm746_vm2, %v2570_v21  ;;  %3548 = vmax.xlane.f32.xlu0 %v3547_v26  ;;  %v5447_v21 = vpop.eup %5446 }
 0x8c9   : > { %4777 = vmatprep.mubr.msk.f32.mxu1 %vm746_vm2, %v2144_v63  ;;  %v6582_v54 = vpop.f32.mrb[52].mxu0  ;;  %5454 = vpow2.f32 %v3041_v35  ;;  %v3047_v27 = vsel %vm1934_vm5, %v5447_v21, 0.0 }
 0x8ca   : > { %v6587_v36 = vpop.f32.mrb[53].mxu0  ;;  %v3556_v1 = vsel %vm1934_vm5, %v6582_v54, -inf  ;;  %5456 = vpow2.f32 %v3043_v10 }
 0x8cb   : > { %3557 = vmax.xlane.f32.xlu1 %v3556_v1  ;;  %v3553_v55 = vsel %vm1934_vm5, %v6587_v36, -inf  ;;  %5458 = vpow2.f32 %v3045_v19 }
 0x8cc   : > { %4778 = vmatmul.mubr.msk.f32.vlgmr.msra.gmra.mrb[30].mxu1 %vm746_vm2, %v2145_v24  ;;  %3554 = vmax.xlane.f32.xlu0 %v3553_v55  ;;  %v5449_v4 = vpop.eup %5448 }
 0x8cd   : > { %5116 = vmatpush3.bf16.msra.mxu1 %v6553_v7  ;;  %4780 = vmatprep.mubr.msk.f32.mxu1 %vm746_vm2, %v2146_v40  ;;  %v6599_v30 = vpop.f32.mrb[54].mxu0  ;;  %v5451_v12 = vpop.eup %5450  ;;  %v3053_v48 = vsel %vm1934_vm5, %v5449_v4, 0.0 }
 0x8ce   : > { %5118 = vmatprep.subr.bf16.mxu1 %v5117_v0  ;;  %v6604_v39 = vpop.f32.mrb[55].mxu0  ;;  %v3562_v59 = vsel %vm1934_vm5, %v6599_v30, -inf  ;;  %v3056_v17 = vsel %vm1934_vm5, %v5451_v12, 0.0 }
 0x8cf   : > { %3563 = vmax.xlane.f32.xlu1 %v3562_v59  ;;  %v3559_v7 = vsel %vm1934_vm5, %v6604_v39, -inf }
 0x8d0   : > { %4781 = vmatmul.mubr.msk.f32.gmra.mrb[32].mxu1 %vm746_vm2, %v2147_v9  ;;  %3560 = vmax.xlane.f32.xlu0 %v3559_v7 }
 0x8d1   : > { %5120 = vmatpush3.bf16.msra.mxu1 %v5117_v0  ;;  %4783 = vmatprep.mubr.msk.f32.mxu1 %vm746_vm2, %v2148_v31  ;;  %v6615_v43 = vpop.f32.mrb[56].mxu0  ;;  %v5453_v28 = vpop.eup %5452 }
 0x8d2   : > { %5122 = vmatprep.subr.bf16.mxu1 %v5121_v62  ;;  %v6619_v57 = vpop.f32.mrb[57].mxu0  ;;  %v3568_v16 = vsel %vm1934_vm5, %v6615_v43, -inf  ;;  %v3059_v34 = vsel %vm1934_vm5, %v5453_v28, 0.0 }
 0x8d3   : > { %v3565_v8 = vsel %vm1934_vm5, %v6619_v57, -inf  ;;  %v5455_v26 = vpop.eup %5454 }
 0x8d4   : > { %4784 = vmatmul.mubr.msk.f32.gmra.mrb[34].mxu1 %vm746_vm2, %v2149_v58  ;;  %3566 = vmax.xlane.f32.xlu0 %v3565_v8  ;;  %v5457_v63 = vpop.eup %5456  ;;  %v3062_v24 = vsel %vm1934_vm5, %v5455_v26, 0.0 }
 0x8d5   : > { %5124 = vmatpush3.bf16.msra.mxu1 %v5121_v62  ;;  %4786 = vmatprep.mubr.msk.f32.mxu1 %vm746_vm2, %v2150_v3  ;;  %v3065_v51 = vsel %vm1934_vm5, %v5457_v63, 0.0 }
 0x8d6   : > { %5126 = vmatprep.subr.bf16.mxu1 %v5125_v52 }
 0x8d8   : > { %4787 = vmatmul.mubr.msk.f32.gmra.mrb[36].mxu1 %vm746_vm2, %v2151_v46  ;;  %3569 = vmax.xlane.f32.xlu0 %v3568_v16 }
 0x8d9   : > { %5128 = vmatpush3.bf16.msra.mxu1 %v5125_v52  ;;  %4833 = vmatprep.mubr.msk.f32.mxu1 %vm1934_vm5, %v5447_v21 }
 0x8da   : > { %4845 = vmatprep.subr.mxu1 %v3240_v20 }
 0x8dc   : > { %4834 = vmatmul.mubr.msk.f32.vlgmr.msra.gmra.mrb[38].mxu1 %vm1934_vm5, %v5445_v50  ;;  %3051 = vadd.xlane.f32.xlu0 %v3050_v41 }
 0x8dd   : > { %4836 = vmatprep.mubr.msk.f32.mxu1 %vm1934_vm5, %v5449_v4  ;;  %4846 = vmatpush3.msra.mxu1 %v3240_v20 }
 0x8e0   : > { %4837 = vmatmul.mubr.msk.f32.gmra.mrb[40].mxu1 %vm1934_vm5, %v5451_v12  ;;  %5357 = vrot.lane.b32.xlu1 %v6068_v13, %s5601_s18  ;;  %v5459_v13 = vpop.eup %5458 }
 0x8e1   : > { %3054 = vadd.xlane.f32.xlu0 %v3053_v48  ;;  %4839 = vmatprep.mubr.msk.f32.mxu1 %vm1934_vm5, %v5453_v28  ;;  %v3068_v15 = vsel %vm1934_vm5, %v5459_v13, 0.0 }
 0x8e4   : > { %4840 = vmatmul.mubr.msk.f32.gmra.mrb[42].mxu1 %vm1934_vm5, %v5455_v26 }
 0x8e5   : > { %3060 = vadd.xlane.f32.xlu0 %v3059_v34  ;;  %4842 = vmatprep.mubr.msk.f32.mxu1 %vm1934_vm5, %v5457_v63 }
 0x8e8   : > { %4843 = vmatmul.mubr.msk.f32.gmra.mrb[44].mxu1 %vm1934_vm5, %v5459_v13 }
 0x8e9   : > { %3066 = vadd.xlane.f32.xlu0 %v3065_v51 }
 0x8ff   : > { %5362 = vrot.lane.b32.xlu0 %v6086_v29, %s5601_s18 }
 0x904   : > { %3048 = vadd.xlane.f32.xlu1 %v3047_v27 }
 0x908   : > { %3057 = vadd.xlane.f32.xlu1 %v3056_v17 }
 0x90c   : > { %3063 = vadd.xlane.f32.xlu1 %v3062_v24 }
 0x910   : > { %3069 = vadd.xlane.f32.xlu1 %v3068_v15 }
 0x921   : > { %5367 = vrot.lane.b32.xlu1 %v6098_v32, %s5601_s18 }
 0x925   : > { %5372 = vrot.lane.b32.xlu1 %v6108_v47, %s5601_s18  ;;  %s5520_s18 = sshll.u32 %s5602_s17, 4  ;;  %s5521_s18 = int_to_ptr.vmem [resolvable:$false] %s5520_s18 }
 0x926   : > { %s5522_s29 = scalar_lea.vmem %s5521_s18, 2048  ;;  %p5523_p1 = scmp.lt.s32.totalorder %s6774_s24, %s5521_s18 }
 0x954   : > { %v3552_v61 = vpop.xlane.xlu1 %3551 }
 0x955   : > { %v3572_v29 = vsub.f32 %v6566_v14, %v3552_v61  ;;  %v3549_v1 = vpop.xlane.xlu0 %3548 }
 0x956   : > { %v3571_v55 = vsub.f32 %v6571_v37, %v3549_v1 }
 0x957   : > { %v3581_v40 = vmul.f32 1.442695, %v3572_v29 }
 0x958   : > { %v3579_v44 = vmul.f32 1.442695, %v3571_v55  ;;  %v3558_v23 = vpop.xlane.xlu1 %3557 }
 0x959   : > { %5460 = vpow2.f32 %v3581_v40  ;;  %v3574_v25 = vsub.f32 %v6582_v54, %v3558_v23  ;;  %v3555_v0 = vpop.xlane.xlu0 %3554 }
 0x95a   : > { %5462 = vpow2.f32 %v3579_v44  ;;  %v3573_v60 = vsub.f32 %v6587_v36, %v3555_v0 }
 0x95b   : > { %v3585_v32 = vmul.f32 1.442695, %v3574_v25 }
 0x95c   : > { %v3583_v2 = vmul.f32 1.442695, %v3573_v60  ;;  %v3564_v9 = vpop.xlane.xlu1 %3563 }
 0x95d   : > { %5464 = vpow2.f32 %v3585_v32  ;;  %v3576_v47 = vsub.f32 %v6599_v30, %v3564_v9  ;;  %v3561_v14 = vpop.xlane.xlu0 %3560 }
 0x95e   : > { %5466 = vpow2.f32 %v3583_v2  ;;  %v3575_v37 = vsub.f32 %v6604_v39, %v3561_v14 }
 0x95f   : > { %v3589_v6 = vmul.f32 1.442695, %v3576_v47 }
 0x960   : > { %v3587_v38 = vmul.f32 1.442695, %v3575_v37  ;;  %v5358_v59 = vpop.permute.xlu1 %5357 }
 0x961   : > { %5468 = vpow2.f32 %v3589_v6  ;;  %v5360_v18 = vunpack.i.h.bf16 %v5358_v59  ;;  %v5359_v54 = vunpack.i.l.bf16 %v5358_v59  ;;  %v3567_v7 = vpop.xlane.xlu0 %3566 }
 0x962   : > { %5470 = vpow2.f32 %v3587_v38  ;;  %v3577_v36 = vsub.f32 %v6619_v57, %v3567_v7 }
 0x963   : > { %v6667_v31 = vpop.eup %5460  ;;  %v6669_v53 = vpack.c.bf16 %v5360_v18, %v5359_v54 }
 0x964   : > { %v6671_v62 = vpop.eup %5462  ;;  %v3591_v30 = vmul.f32 1.442695, %v3577_v36  ;;  %v3598_v39 = vsel %vm1934_vm5, %v6667_v31, 0.0 }
 0x965   : > { %3599 = vadd.xlane.f32.xlu0 %v3598_v39  ;;  %v3570_v45 = vpop.xlane.xlu0 %3569  ;;  %5154 = vmatprep.subr.bf16.mxu1 %v6669_v53  ;;  %v3595_v56 = vsel %vm1934_vm5, %v6671_v62, 0.0 }
 0x966   : > { %5472 = vpow2.f32 %v3591_v30  ;;  %v3578_v33 = vsub.f32 %v6615_v43, %v3570_v45  ;;  %3596 = vadd.xlane.f32.xlu1 %v3595_v56  ;;  %v3788_v30 = vld [vmem:[%s6840_s12 + $0x18] sm:$0xff] }
 0x967   : > { %v6679_v11 = vpop.eup %5464 }
 0x968   : > { %v6681_v49 = vpop.eup %5466  ;;  %v3593_v5 = vmul.f32 1.442695, %v3578_v33  ;;  %v3604_v57 = vsel %vm1934_vm5, %v6679_v11, 0.0 }
 0x969   : > { %v3601_v58 = vsel %vm1934_vm5, %v6681_v49, 0.0  ;;  %v3052_v46 = vpop.xlane.xlu0 %3051 }
 0x96a   : > { %5474 = vpow2.f32 %v3593_v5  ;;  %3605 = vadd.xlane.f32.xlu1 %v3604_v57  ;;  %3602 = vadd.xlane.f32.xlu0 %v3601_v58 }
 0x96b   : > { %v6687_v22 = vpop.eup %5468 }
 0x96c   : > { %v6689_v8 = vpop.eup %5470  ;;  %v3610_v43 = vsel %vm1934_vm5, %v6687_v22, 0.0 }
 0x96d   : > { %v3607_v3 = vsel %vm1934_vm5, %v6689_v8, 0.0 }
 0x96e   : > { %3611 = vadd.xlane.f32.xlu1 %v3610_v43  ;;  %3608 = vadd.xlane.f32.xlu0 %v3607_v3  ;;  %v3055_v16 = vpop.xlane.xlu0 %3054 }
 0x970   : > { %v6695_v52 = vpop.eup %5472 }
 0x971   : > { %v3613_v35 = vsel %vm1934_vm5, %v6695_v52, 0.0 }
 0x972   : > { %3614 = vadd.xlane.f32.xlu0 %v3613_v35  ;;  %v3061_v19 = vpop.xlane.xlu0 %3060 }
 0x974   : > { %v6699_v42 = vpop.eup %5474 }
 0x975   : > { %v3616_v10 = vsel %vm1934_vm5, %v6699_v42, 0.0 }
 0x976   : > { %3617 = vadd.xlane.f32.xlu1 %v3616_v10  ;;  %v3067_v4 = vpop.xlane.xlu0 %3066 }
 0x97a   : > { %v5363_v28 = vpop.permute.xlu0 %5362 }
 0x97b   : > { %v5365_v34 = vunpack.i.h.bf16 %v5363_v28  ;;  %v5364_v20 = vunpack.i.l.bf16 %v5363_v28 }
 0x97d   : > { %v5157_v61 = vpack.c.bf16 %v5365_v34, %v5364_v20 }
 0x991   : > { %v3049_v50 = vpop.xlane.xlu1 %3048 }
 0x992   : > { %5476 = vrcp.f32 %v3049_v50 }
 0x993   : > { %5478 = vrcp.f32 %v3052_v46 }
 0x994   : > { %5480 = vrcp.f32 %v3055_v16 }
 0x995   : > { %v3058_v21 = vpop.xlane.xlu1 %3057 }
 0x996   : > { %5482 = vrcp.f32 %v3058_v21 }
 0x997   : > { %5484 = vrcp.f32 %v3061_v19 }
 0x999   : > { %v3064_v41 = vpop.xlane.xlu1 %3063 }
 0x99a   : > { %5486 = vrcp.f32 %v3064_v41 }
 0x99b   : > { %5488 = vrcp.f32 %v3067_v4 }
 0x99c   : > { %v5477_v63 = vpop.eup %5476 }
 0x99d   : > { %v3070_v12 = vpop.xlane.xlu1 %3069  ;;  %v5479_v51 = vpop.eup %5478 }
 0x99e   : > { %5490 = vrcp.f32 %v3070_v12  ;;  %v5481_v15 = vpop.eup %5480 }
 0x9a0   : > { %v5483_v40 = vpop.eup %5482 }
 0x9a1   : > { %v5368_v48 = vpop.permute.xlu1 %5367  ;;  %v5485_v60 = vpop.eup %5484 }
 0x9a2   : > { %v5370_v29 = vunpack.i.h.bf16 %v5368_v48  ;;  %v5369_v1 = vunpack.i.l.bf16 %v5368_v48 }
 0x9a4   : > { %v5161_v32 = vpack.c.bf16 %v5370_v29, %v5369_v1  ;;  %v5487_v14 = vpop.eup %5486 }
 0x9a5   : > { %v5373_v44 = vpop.permute.xlu1 %5372  ;;  %v5489_v59 = vpop.eup %5488 }
 0x9a6   : > { %v5375_v2 = vunpack.i.h.bf16 %v5373_v44  ;;  %v5374_v9 = vunpack.i.l.bf16 %v5373_v44 }
 0x9a8   : > { %v5165_v18 = vpack.c.bf16 %v5375_v2, %v5374_v9  ;;  %v5491_v7 = vpop.eup %5490  ;;  %v5512_v2 = vld [vmem:[%s5905_s25 + $0x28] sm:$0xff] }
 0x9af   : > { %v4835_v26 = vpop.f32.mrb[38].mxu1 }
 0x9b0   : > { %v3185_v13 = vpop.f32.mrb[39].mxu1  ;;  %v3233_v17 = vmul.f32 %v5479_v51, %v4835_v26  ;;  %v5508_v51 = vld [vmem:[%s5905_s25 + $0x8] sm:$0xff] }
 0x9b1   : > { %v3232_v27 = vmul.f32 %v5477_v63, %v3185_v13  ;;  %v4252_v13 = vld [vmem:[%s6841_s13] ss:$0 sm:$0xff] }
 0x9b3   : > { %v4838_v24 = vpop.f32.mrb[40].mxu1  ;;  %4847 = vmatprep.mubr.msk.f32.mxu1 %vm746_vm2, %v3232_v27 }
 0x9b4   : > { %v3195_v55 = vpop.f32.mrb[41].mxu1  ;;  %4848 = vmatmul.mubr.msk.f32.vlgmr.msra.gmra.mrb[30].mxu1 %vm746_vm2, %v3233_v17  ;;  %v3235_v25 = vmul.f32 %v5483_v40, %v4838_v24  ;;  %v5509_v24 = vld [vmem:[%s5905_s25] sm:$0xff] }
 0x9b5   : > { %v3234_v23 = vmul.f32 %v5481_v15, %v3195_v55  ;;  %5156 = vmatpush3.bf16.msra.mxu1 %v6669_v53  ;;  %v5510_v55 = vld [vmem:[%s5905_s25 + $0x18] sm:$0xff] }
 0x9b6   : > { %5158 = vmatprep.subr.bf16.mxu1 %v5157_v61 }
 0x9b7   : > { %v4841_v0 = vpop.f32.mrb[42].mxu1  ;;  %4850 = vmatprep.mubr.msk.f32.mxu1 %vm746_vm2, %v3234_v23  ;;  %v5511_v23 = vld [vmem:[%s5905_s25 + $0x10] sm:$0xff] }
 0x9b8   : > { %v3205_v47 = vpop.f32.mrb[43].mxu1  ;;  %4851 = vmatmul.mubr.msk.f32.gmra.mrb[32].mxu1 %vm746_vm2, %v3235_v25  ;;  %v3237_v6 = vmul.f32 %v5487_v14, %v4841_v0  ;;  %v5513_v14 = vld [vmem:[%s5905_s25 + $0x20] sm:$0xff] }
 0x9b9   : > { %v3236_v37 = vmul.f32 %v5485_v60, %v3205_v47  ;;  %5160 = vmatpush3.bf16.msra.mxu1 %v5157_v61 }
 0x9ba   : > { %5162 = vmatprep.subr.bf16.mxu1 %v5161_v32 }
 0x9bb   : > { %v4844_v38 = vpop.f32.mrb[44].mxu1  ;;  %4853 = vmatprep.mubr.msk.f32.mxu1 %vm746_vm2, %v3236_v37 }
 0x9bc   : > { %v3215_v54 = vpop.f32.mrb[45].mxu1  ;;  %4854 = vmatmul.mubr.msk.f32.gmra.mrb[34].mxu1 %vm746_vm2, %v3237_v6  ;;  %v3239_v53 = vmul.f32 %v5491_v7, %v4844_v38 }
 0x9bd   : > { %v3238_v36 = vmul.f32 %v5489_v59, %v3215_v54  ;;  %5164 = vmatpush3.bf16.msra.mxu1 %v5161_v32 }
 0x9be   : > { %5166 = vmatprep.subr.bf16.mxu1 %v5165_v18 }
 0x9bf   : > { %4856 = vmatprep.mubr.msk.f32.mxu1 %vm746_vm2, %v3238_v36  ;;  %v5515_v36 = vld [vmem:[%s5905_s25 + $0x30] sm:$0xff] }
 0x9c0   : > { %4857 = vmatmul.mubr.msk.f32.gmra.mrb[36].mxu1 %vm746_vm2, %v3239_v53 }
 0x9c1   : > { %5168 = vmatpush3.bf16.msra.mxu1 %v5165_v18  ;;  %4903 = vmatprep.mubr.msk.f32.mxu1 %vm1934_vm5, %v6671_v62  ;;  %v5514_v18 = vld [vmem:[%s5905_s25 + $0x38] sm:$0xff]  ;;  %s5516_s25 = scalar_lea.vmem %s6774_s24, 1024 }
 0x9c2   : > { %4915 = vmatprep.subr.mxu1 %v3788_v30  ;;  %p5517_p12 = scmp.ne.s32.totalorder %s6774_s24, %s5516_s25  ;;  %p5524_p2 = scmp.lt.s32.totalorder %s5522_s29, %s5516_s25 }
 0x9c4   : > { %4904 = vmatmul.mubr.msk.f32.vlgmr.msra.gmra.mrb[46].mxu1 %vm1934_vm5, %v6667_v31  ;;  %p5518_p13 = pnand %p5517_p12, %p5725_p4  ;;  %p5525_p3 = por %p5524_p2, %p5523_p1 }
 0x9c5   : > { %4906 = vmatprep.mubr.msk.f32.mxu1 %vm1934_vm5, %v6681_v49  ;;  %4916 = vmatpush3.msra.mxu1 %v3788_v30 }
 0x9c6   : > { %p5519_p0 = pneg %p5518_p13 }
 0x9c8   : > { %4907 = vmatmul.mubr.msk.f32.gmra.mrb[48].mxu1 %vm1934_vm5, %v6679_v11  ;;  %p5526_p5 = pnand %p5525_p3, %p5519_p0 }
 0x9c9   : > { %4909 = vmatprep.mubr.msk.f32.mxu1 %vm1934_vm5, %v6689_v8 }
 0x9cc   : > { %4910 = vmatmul.mubr.msk.f32.gmra.mrb[50].mxu1 %vm1934_vm5, %v6687_v22 }
 0x9cd   : > { %4912 = vmatprep.mubr.msk.f32.mxu1 %vm1934_vm5, %v6695_v52 }
 0x9d0   : > { %4913 = vmatmul.mubr.msk.f32.gmra.mrb[52].mxu1 %vm1934_vm5, %v6699_v42 }
 0x9f2   : > { %v3600_v31 = vpop.xlane.xlu0 %3599 }
 0x9f3   : > { %v3597_v62 = vpop.xlane.xlu1 %3596 }
 0x9f4   : > { %5492 = vrcp.f32 %v3597_v62 }
 0x9f5   : > { %5494 = vrcp.f32 %v3600_v31 }
 0x9f7   : > { %v3603_v39 = vpop.xlane.xlu0 %3602  ;;  %v3606_v45 = vpop.xlane.xlu1 %3605 }
 0x9f8   : > { %5496 = vrcp.f32 %v3603_v39 }
 0x9f9   : > { %5498 = vrcp.f32 %v3606_v45 }
 0x9fb   : > { %v3609_v56 = vpop.xlane.xlu0 %3608  ;;  %v3612_v33 = vpop.xlane.xlu1 %3611 }
 0x9fc   : > { %5500 = vrcp.f32 %v3609_v56 }
 0x9fd   : > { %5502 = vrcp.f32 %v3612_v33 }
 0x9fe   : > { %v5493_v5 = vpop.eup %5492 }
 0x9ff   : > { %v3615_v11 = vpop.xlane.xlu0 %3614  ;;  %v5495_v22 = vpop.eup %5494 }
 0xa00   : > { %5504 = vrcp.f32 %v3615_v11 }
 0xa02   : > { %v5497_v52 = vpop.eup %5496 }
 0xa03   : > { %v3618_v57 = vpop.xlane.xlu1 %3617  ;;  %v5499_v42 = vpop.eup %5498 }
 0xa04   : > { %5506 = vrcp.f32 %v3618_v57 }
 0xa06   : > { %v5501_v16 = vpop.eup %5500 }
 0xa07   : > { %v5503_v19 = vpop.eup %5502 }
 0xa0a   : > { %v5505_v28 = vpop.eup %5504 }
 0xa0e   : > { %v5507_v26 = vpop.eup %5506 }
 0xa97   : > { %v4905_v49 = vpop.f32.mrb[46].mxu1 }
 0xa98   : > { %v3733_v58 = vpop.f32.mrb[47].mxu1  ;;  %v3781_v43 = vmul.f32 %v5495_v22, %v4905_v49 }
 0xa99   : > { %v3780_v8 = vmul.f32 %v5493_v5, %v3733_v58 }
 0xa9b   : > { %v4908_v3 = vpop.f32.mrb[48].mxu1  ;;  %4917 = vmatprep.mubr.msk.f32.mxu1 %vm746_vm2, %v3780_v8 }
 0xa9c   : > { %v3743_v35 = vpop.f32.mrb[49].mxu1  ;;  %4918 = vmatmul.mubr.msk.f32.vlgmr.msra.gmra.mrb[30].mxu1 %vm746_vm2, %v3781_v43  ;;  %v3783_v46 = vmul.f32 %v5499_v42, %v4908_v3 }
 0xa9d   : > { %v3782_v10 = vmul.f32 %v5497_v52, %v3743_v35 }
 0xa9f   : > { %v4911_v50 = vpop.f32.mrb[50].mxu1  ;;  %4920 = vmatprep.mubr.msk.f32.mxu1 %vm746_vm2, %v3782_v10 }
 0xaa0   : > { %v3753_v21 = vpop.f32.mrb[51].mxu1  ;;  %4921 = vmatmul.mubr.msk.f32.gmra.mrb[32].mxu1 %vm746_vm2, %v3783_v46  ;;  %v3785_v4 = vmul.f32 %v5503_v19, %v4911_v50 }
 0xaa1   : > { %v3784_v41 = vmul.f32 %v5501_v16, %v3753_v21 }
 0xaa3   : > { %v4914_v12 = vpop.f32.mrb[52].mxu1  ;;  %4923 = vmatprep.mubr.msk.f32.mxu1 %vm746_vm2, %v3784_v41 }
 0xaa4   : > { %v3763_v48 = vpop.f32.mrb[53].mxu1  ;;  %4924 = vmatmul.mubr.msk.f32.gmra.mrb[34].mxu1 %vm746_vm2, %v3785_v4  ;;  %v3787_v34 = vmul.f32 %v5507_v26, %v4914_v12 }
 0xaa5   : > { %v3786_v63 = vmul.f32 %v5505_v28, %v3763_v48 }
 0xaa7   : > { %4926 = vmatprep.mubr.msk.f32.mxu1 %vm746_vm2, %v3786_v63 }
 0xaa8   : > { %4927 = vmatmul.mubr.msk.f32.gmra.mrb[36].mxu1 %vm746_vm2, %v3787_v34 }
 0xb6f   : > { %v4919_v20 = vpop.f32.mrb[30].mxu1 }
 0xb70   : > { %v3927_v27 = vadd.f32 %v5508_v51, %v4919_v20  ;;  %v3879_v17 = vpop.f32.mrb[31].mxu1 }
 0xb71   : > { %v3926_v15 = vadd.f32 %v5509_v24, %v3879_v17 }
 0xb72   : > { %v3942_v61 = vadd.f32 %v4252_v13, %v3927_v27 }
 0xb73   : > { %v3941_v29 = vadd.f32 %v4252_v13, %v3926_v15  ;;  %v4922_v1 = vpop.f32.mrb[32].mxu1 }
 0xb74   : > { %3950 = vst.msk [vmem:[%s6747_s27 + $0x8] sm:$0xff] %vm544_vm1, %v3942_v61  ;;  %v3929_v40 = vadd.f32 %v5510_v55, %v4922_v1  ;;  %v3889_v44 = vpop.f32.mrb[33].mxu1 }
 0xb75   : > { %3949 = vst.msk [vmem:[%s6747_s27] sm:$0xff] %vm544_vm1, %v3941_v29  ;;  %v3928_v25 = vadd.f32 %v5511_v23, %v3889_v44 }
 0xb76   : > { %v3944_v0 = vadd.f32 %v4252_v13, %v3929_v40 }
 0xb77   : > { %v3943_v60 = vadd.f32 %v4252_v13, %v3928_v25  ;;  %v4925_v32 = vpop.f32.mrb[34].mxu1 }
 0xb78   : > { %3952 = vst.msk [vmem:[%s6747_s27 + $0x18] sm:$0xff] %vm544_vm1, %v3944_v0  ;;  %v3931_v9 = vadd.f32 %v5512_v2, %v4925_v32  ;;  %v3899_v47 = vpop.f32.mrb[35].mxu1 }
 0xb79   : > { %3951 = vst.msk [vmem:[%s6747_s27 + $0x10] sm:$0xff] %vm544_vm1, %v3943_v60  ;;  %v3930_v37 = vadd.f32 %v5513_v14, %v3899_v47 }
 0xb7a   : > { %v3946_v6 = vadd.f32 %v4252_v13, %v3931_v9 }
 0xb7b   : > { %v3945_v38 = vadd.f32 %v4252_v13, %v3930_v37  ;;  %v4928_v59 = vpop.f32.mrb[36].mxu1 }
 0xb7c   : > { %3954 = vst.msk [vmem:[%s6747_s27 + $0x28] sm:$0xff] %vm544_vm1, %v3946_v6  ;;  %v3933_v54 = vadd.f32 %v5514_v18, %v4928_v59  ;;  %v3909_v7 = vpop.f32.mrb[37].mxu1 }
 0xb7d   : > { %3953 = vst.msk [vmem:[%s6747_s27 + $0x20] sm:$0xff] %vm544_vm1, %v3945_v38  ;;  %v3932_v53 = vadd.f32 %v5515_v36, %v3909_v7 }
 0xb7e   : > { %v3948_v30 = vadd.f32 %v4252_v13, %v3933_v54 }
 0xb7f   : > { %v3947_v31 = vadd.f32 %v4252_v13, %v3932_v53 }
 0xb80   : > { %3956 = vst.msk [vmem:[%s6747_s27 + $0x38] sm:$0xff] %vm544_vm1, %v3948_v30 }
 0xb81   : > { %3955 = vst.msk [vmem:[%s6747_s27 + $0x30] sm:$0xff] %vm544_vm1, %v3947_v31 }
 0xb82   : > { %5529 = shalt.err (!%p5526_p5)
}
 0xb83   : > { %s5530_s15 = scalar_lea.hbm %s6772_s14, 1024  ;;  %s5534_s17 = scalar_lea.hbm %s6862_s1, 2048 }
 0xb84   : > { %p5531_p6 = scmp.ne.s32.totalorder %s6772_s14, %s5530_s15  ;;  %p5535_p10 = scmp.lt.u32.totalorder %s6772_s14, %s6862_s1 }
 0xb85   : > { %p5536_p11 = scmp.lt.u32.totalorder %s5534_s17, %s5530_s15  ;;  %p5538_p13 = scmp.lt.u32.totalorder %s5530_s15, %s6772_s14 }
 0xb86   : > { %p5532_p7 = pnand %p5531_p6, %p5725_p4 }
 0xb87   : > { %p5537_p12 = por %p5536_p11, %p5535_p10 }
 0xb88   : > { %p5533_p9 = pneg %p5532_p7 }
 0xb89   : > { %p5539_p0 = por %p5538_p13, %p5537_p12 }
 0xb8b   : > { %p5540_p1 = pnand %p5539_p0, %p5533_p9 }
 0xb8d   : > { %5543 = shalt.err (!%p5540_p1)
}
 0xb8e   : > { %s5603_s25 = smov 128   ;;  %s5604_s29 = smov 8  }
 0xb8f   : > { %5193 = dma.vmem_to_hbm [thread:$0]  (%p5725_p4), %s6774_s24, 1024, %s6772_s14, %s6782_s21, %s5603_s25, %s5603_s25, %s5604_s29  }
 0xb90 PF: > { %s6863_s0 = sld [smem:[#allocation9_spill]]  ;;  %p5199_p2 = scmp.ge.s32.totalorder %s5594_s23, 2 }
 0xb92   : > { %p5196_p3 = pnand %p5199_p2, %p5732_p8 }
 0xb96   : > { %s3988_s2 = sand.u32 1, %s6863_s0  }
 0xb97   : > { %s3989_s15 = scalar_lea.sflag [#allocation7], %s3988_s2 }
 0xb98   : > { %5569 = dma.done.wait (!%p5196_p3), %s3989_s15, 1024  }
 0xb99   : > { %5571 = vsyncadd (!%p5196_p3), %s3989_s15, 4294966272  ;;  %s28_s23 = sadd.s32 1, %s5594_s23   ;;  %s6864_s18 = smov %s5578_s19 }
 0xb9a   : > { %p25_p5 = scmp.ge.s32.totalorder %s28_s23, 4   ;;  %s6865_s19 = smov %s5582_s20 }
 0xb9b   : > { %s6866_s20 = smov %s5738_s16  ;;  %s6867_s21 = smov %s5590_s22 }
 0xb9c   : > { %s6868_s22 = smov %s6870_s26  ;;  %27 = sbr.rel (!%p25_p5) target bundleno = 10 (0xa), region = 123 }
 0xba3   :  { %3994 = vsyncpa [#allocation7], 1 }
 0xba4   :  { %3996 = vsyncpa [#allocation7 + $0x1], 1 }

</bundles_post_ra>
